<compile_context>
chip_gen: v5e
topology: v5e:2x2
jax: 0.10.0
libtpu: 0.0.40
codegen_flags: <defaults>
</compile_context>

<pallas_src>
import jax
import jax.numpy as jnp
from jax import lax
from jax.experimental import pallas as pl
from jax.experimental.pallas import tpu as pltpu


def _round_up(x, m):
    return ((x + m - 1) // m) * m


# ----------------------------------------------------------------------------
# Pallas kernel: one grid step == one chunk of `Tc` GRU timesteps for one
# batch tile.  The hidden-state carry is the (Bt, Hp) output block itself
# (constant block index along the time axis -> resident accumulator).
# ----------------------------------------------------------------------------
def _gru_chunk_kernel(gi_ref,    # (Tc, Bt, 3*Hp) precomputed input projections
                      len_ref,   # (Bt, 1) int32   sequence lengths
                      h0_ref,    # (Bt, Hp)        initial hidden state
                      whh_ref,   # (Hp, 3*Hp)      hidden->hidden weights (r|z|n)
                      bhn_ref,   # (1, Hp)         hidden bias of the n gate
                      out_ref,   # (Tc, Bt, Hp)    per-timestep outputs
                      h_ref,     # (Bt, Hp)        hidden-state carry / final hidden
                      ):
    c = pl.program_id(1)                   # time-chunk index (innermost, serial)
    Tc = gi_ref.shape[0]
    Hp = h_ref.shape[-1]

    @pl.when(c == 0)
    def _():
        h_ref[...] = h0_ref[...]

    w_hh = whh_ref[...]                    # hoisted loads (loop-invariant)
    b_hn = bhn_ref[...]
    lens = len_ref[...]                    # (Bt, 1) int32
    t0 = c * Tc

    def step(i, h):
        gi_t = gi_ref[i]                   # (Bt, 3*Hp); includes b_ih + b_hh[r,z]
        gh = jnp.dot(h, w_hh, preferred_element_type=jnp.float32)
        r = jax.nn.sigmoid(gi_t[:, 0 * Hp:1 * Hp] + gh[:, 0 * Hp:1 * Hp])
        z = jax.nn.sigmoid(gi_t[:, 1 * Hp:2 * Hp] + gh[:, 1 * Hp:2 * Hp])
        n = jnp.tanh(gi_t[:, 2 * Hp:3 * Hp] + r * (gh[:, 2 * Hp:3 * Hp] + b_hn))
        h_cand = n + z * (h - n)           # == (1 - z) * n + z * h
        valid = (t0 + i) < lens            # (Bt, 1) bool, packed-sequence mask
        out_ref[i] = jnp.where(valid, h_cand, 0.0)   # pad_packed padding_value=0
        return jnp.where(valid, h_cand, h)           # freeze state past length

    h_ref[...] = lax.fori_loop(0, Tc, step, h_ref[...], unroll=True)


def gru_recurrence_pallas(gi, lens2d, h0, w_hh, b_hn, *, time_chunk, batch_tile):
    """gi: (Tp, Bp, 3*Hp) f32 precomputed input projections (biases folded);
    lens2d: (Bp, 1) int32; h0: (Bp, Hp) f32; w_hh: (Hp, 3*Hp); b_hn: (1, Hp).
    All shapes already padded: Hp % 128 == 0, Bp % 8 == 0, Tp % time_chunk == 0."""
    Tp, Bp, threeHp = gi.shape
    Hp = h0.shape[-1]
    assert threeHp == 3 * Hp
    Tc, Bt = time_chunk, batch_tile
    assert Tp % Tc == 0 and Bp % Bt == 0
    nb, nc = Bp // Bt, Tp // Tc

    grid_spec = pltpu.PrefetchScalarGridSpec(
        num_scalar_prefetch=0,
        grid=(nb, nc),                      # batch tiles outer, time chunks inner
        in_specs=[
            pl.BlockSpec((Tc, Bt, 3 * Hp), lambda b, c: (c, b, 0)),   # gi chunk
            pl.BlockSpec((Bt, 1), lambda b, c: (b, 0)),               # lengths
            pl.BlockSpec((Bt, Hp), lambda b, c: (b, 0)),              # h0
            pl.BlockSpec((Hp, 3 * Hp), lambda b, c: (0, 0)),          # W_hh
            pl.BlockSpec((1, Hp), lambda b, c: (0, 0)),               # b_hh_n
        ],
        out_specs=[
            pl.BlockSpec((Tc, Bt, Hp), lambda b, c: (c, b, 0)),       # outputs
            pl.BlockSpec((Bt, Hp), lambda b, c: (b, 0)),              # h carry/final
        ],
    )

    out, h_fin = pl.pallas_call(
        _gru_chunk_kernel,
        grid_spec=grid_spec,
        out_shape=(
            jax.ShapeDtypeStruct((Tp, Bp, Hp), jnp.float32),
            jax.ShapeDtypeStruct((Bp, Hp), jnp.float32),
        ),
        compiler_params=pltpu.CompilerParams(
            dimension_semantics=("parallel", "arbitrary"),  # batch parallel (v7x
            vmem_limit_bytes=32 * 1024 * 1024,              # 2 TCs), time serial
        ),
    )(gi, lens2d, h0, w_hh, b_hn)
    return out, h_fin


# ----------------------------------------------------------------------------
# Encoder wrapper: embedding gather, hoisted input projection, padding glue.
# ----------------------------------------------------------------------------
class EncoderPallas:
    def __init__(self, vocab_size, embedding_dim, hidden_size, batch_size, key,
                 *, time_chunk=8):
        self.vocab_size = vocab_size
        self.embedding_dim = embedding_dim
        self.hidden_size = hidden_size
        self.batch_size = batch_size
        self.time_chunk = time_chunk

        H = hidden_size
        Hp = _round_up(H, 128)              # lane-dense hidden dimension
        self.H_pad = Hp

        k_emb, k_wih, k_whh, k_bih, k_bhh, k_h0 = jax.random.split(key, 6)
        scale = 1.0 / float(hidden_size) ** 0.5
        # nn.Embedding weight: (vocab, E), N(0,1) init.
        self.embedding = jax.random.normal(k_emb, (vocab_size, embedding_dim),
                                           dtype=jnp.float32)
        # nn.GRU weights (torch layout transposed for right-multiplication),
        # gate order r, z, n.
        self.w_ih = jax.random.uniform(k_wih, (embedding_dim, 3 * H),
                                       minval=-scale, maxval=scale, dtype=jnp.float32)
        self.w_hh = jax.random.uniform(k_whh, (H, 3 * H),
                                       minval=-scale, maxval=scale, dtype=jnp.float32)
        self.b_ih = jax.random.uniform(k_bih, (3 * H,),
                                       minval=-scale, maxval=scale, dtype=jnp.float32)
        self.b_hh = jax.random.uniform(k_bhh, (3 * H,),
                                       minval=-scale, maxval=scale, dtype=jnp.float32)
        self._h0_key = k_h0                 # init_hidden(): torch.randn stand-in

        # --- Precompute padded / folded parameters (done once at setup). ---
        def pad_gate_cols(w):
            # (..., 3H) -> (..., 3*Hp): zero-pad each gate's column block so the
            # [r|z|n] slicing stays aligned after padding.
            parts = []
            for g in range(3):
                blk = w[..., g * H:(g + 1) * H]
                pad = [(0, 0)] * (w.ndim - 1) + [(0, Hp - H)]
                parts.append(jnp.pad(blk, pad))
            return jnp.concatenate(parts, axis=-1)

        # Fold the hidden-path biases of r/z into the input-path bias: the
        # recurrent kernel then only needs b_hh_n (PyTorch gate math preserved).
        b_fold = self.b_ih + jnp.concatenate(
            [self.b_hh[:2 * H], jnp.zeros((H,), jnp.float32)])
        self.w_ih_p = pad_gate_cols(self.w_ih)                      # (E, 3*Hp)
        self.b_fold_p = pad_gate_cols(b_fold[None, :])              # (1, 3*Hp)
        w_hh_rows = jnp.pad(self.w_hh, ((0, Hp - H), (0, 0)))       # (Hp, 3H)
        self.w_hh_p = pad_gate_cols(w_hh_rows)                      # (Hp, 3*Hp)
        self.b_hn_p = jnp.pad(self.b_hh[None, 2 * H:],
                              ((0, 0), (0, Hp - H)))                # (1, Hp)

    def init_hidden(self, batch_size):
        return jax.random.normal(self._h0_key, (1, batch_size, self.hidden_size),
                                 dtype=jnp.float32)

    def __call__(self, inputs, lengths):
        """inputs: (B, T) int32 token ids; lengths: (B,) int32, sorted descending
        (pack_padded_sequence enforce_sorted=True contract)."""
        B, T = inputs.shape
        H, Hp = self.hidden_size, self.H_pad
        Tc = self.time_chunk
        Bp = _round_up(B, 8)
        Tp = _round_up(T, Tc)

        # Embedding gather (plain-JAX glue).
        x = self.embedding[inputs]                       # (B, T, E)
        x = jnp.transpose(x, (1, 0, 2))                  # (T, B, E) time-major

        # Hoisted input projection: one batched (T*B, E) x (E, 3*Hp) matmul —
        # the serial Pallas recurrence never touches W_ih or x again.
        gi = (x.reshape(T * B, self.embedding_dim) @ self.w_ih_p
              + self.b_fold_p).reshape(T, B, 3 * Hp)
        gi = jnp.pad(gi, ((0, Tp - T), (0, Bp - B), (0, 0)))

        # Per-batch lengths (padded rows get length 0 -> always masked).
        lens_p = jnp.pad(lengths.astype(jnp.int32), (0, Bp - B))[:, None]  # (Bp,1)

        h0 = self.init_hidden(B)[0]                      # (B, H)
        h0_p = jnp.pad(h0, ((0, Bp - B), (0, Hp - H)))   # padded lanes stay 0

        out_p, hfin_p = gru_recurrence_pallas(
            gi, lens_p, h0_p, self.w_hh_p, self.b_hn_p,
            time_chunk=Tc, batch_tile=min(8, Bp))

        out = out_p[:T, :B, :H]
        h_fin = hfin_p[:B, :H]

        # pad_packed_sequence returns max(lengths) timesteps (batch_first=False).
        # Data-dependent trim is host-side glue (mirrors `.cpu()` in the torch
        # code); skip it if jitting the wrapper and keep the full-T output.
        t_out = int(jnp.max(lengths))
        return out[:t_out], h_fin[None, :, :]


# ----------------------------------------------------------------------------
# Pure-JAX reference (lax.scan, PyTorch gate formulation) for correctness check
# ----------------------------------------------------------------------------
def gru_packed_ref(x_tbe, mask_tb1, h0, w_ih, w_hh, b_ih, b_hh):
    H = h0.shape[-1]

    def step(h, inp):
        x, m = inp
        gi = x @ w_ih + b_ih
        gh = h @ w_hh + b_hh
        r = jax.nn.sigmoid(gi[:, :H] + gh[:, :H])
        z = jax.nn.sigmoid(gi[:, H:2 * H] + gh[:, H:2 * H])
        n = jnp.tanh(gi[:, 2 * H:] + r * gh[:, 2 * H:])
        h_cand = (1.0 - z) * n + z * h
        h_new = m * h_cand + (1.0 - m) * h
        return h_new, m * h_cand

    h_fin, outs = lax.scan(step, h0, (x_tbe, mask_tb1))
    return outs, h_fin


if __name__ == "__main__":
    key = jax.random.PRNGKey(0)
    k_model, k_tok = jax.random.split(key)

    vocab_size, embedding_dim, hidden_size = 40, 16, 32
    batch_size, seq_len = 8, 12            # 12 > time_chunk=8 -> 2 chunks + T pad

    enc = EncoderPallas(vocab_size, embedding_dim, hidden_size, batch_size,
                        k_model, time_chunk=8)

    inputs = jax.random.randint(k_tok, (batch_size, seq_len), 0, vocab_size,
                                dtype=jnp.int32)
    # Sorted-descending lengths (pack_padded_sequence contract).
    lengths = jnp.array([12, 11, 9, 8, 6, 4, 2, 1], dtype=jnp.int32)

    output, hidden = enc(inputs, lengths)
    output = jax.block_until_ready(output)
    hidden = jax.block_until_ready(hidden)

    # Sanity check against a pure-JAX reference.
    x = jnp.transpose(enc.embedding[inputs], (1, 0, 2))
    t_idx = jnp.arange(seq_len, dtype=jnp.int32)[:, None]
    mask = ((t_idx < lengths[None, :]).astype(jnp.float32))[:, :, None]
    ref_out, ref_h = gru_packed_ref(x, mask, enc.init_hidden(batch_size)[0],
                                    enc.w_ih, enc.w_hh, enc.b_ih, enc.b_hh)

    assert output.shape == (int(jnp.max(lengths)), batch_size, hidden_size)
    assert hidden.shape == (1, batch_size, hidden_size)
    assert jnp.allclose(output, ref_out[:output.shape[0]], atol=1e-4, rtol=1e-4)
    assert jnp.allclose(hidden[0], ref_h, atol=1e-4, rtol=1e-4)

    print("KERNEL_OK")
</pallas_src>

<mosaic_0001>
module attributes {stable_mosaic.version = 11 : i64} {
  func.func @_gru_chunk_kernel(%arg0: i32, %arg1: i32, %arg2: memref<8x8x384xf32, #tpu.memory_space<vmem>>, %arg3: memref<8x1xi32, #tpu.memory_space<vmem>>, %arg4: memref<8x128xf32, #tpu.memory_space<vmem>>, %arg5: memref<128x384xf32, #tpu.memory_space<vmem>>, %arg6: memref<1x128xf32, #tpu.memory_space<vmem>>, %arg7: memref<8x8x128xf32, #tpu.memory_space<vmem>>, %arg8: memref<8x128xf32, #tpu.memory_space<vmem>>) attributes {dimension_semantics = [#tpu.dimension_semantics<parallel>, #tpu.dimension_semantics<arbitrary>], iteration_bounds = array<i64: 1, 2>, scalar_prefetch = 0 : i64, scratch_operands = 0 : i64, tpu.core_type = #tpu.core_type<tc>, window_params = [{transform_indices = @transform_0, window_bounds = array<i64: 8, 8, 384>}, {transform_indices = @transform_1, window_bounds = array<i64: 8, 1>}, {transform_indices = @transform_2, window_bounds = array<i64: 8, 128>}, {pipeline_mode = #tpu.pipeline_mode<synchronous>, transform_indices = @transform_3, window_bounds = array<i64: 128, 384>}, {pipeline_mode = #tpu.pipeline_mode<synchronous>, transform_indices = @transform_4, window_bounds = array<i64: 1, 128>}, {transform_indices = @transform_5, window_bounds = array<i64: 8, 8, 128>}, {transform_indices = @transform_6, window_bounds = array<i64: 8, 128>}]} {
    %c0_i32 = arith.constant 0 : i32
    %0 = arith.cmpi eq, %arg1, %c0_i32 : i32
    %1 = arith.extui %0 : i1 to i32
    %c0_i32_0 = arith.constant 0 : i32
    %2 = arith.cmpi ne, %1, %c0_i32_0 : i32
    scf.if %2 {
      %c0_75 = arith.constant 0 : index
      %c0_76 = arith.constant 0 : index
      %361 = vector.load %arg4[%c0_75, %c0_76] : memref<8x128xf32, #tpu.memory_space<vmem>>, vector<8x128xf32>
      %c0_77 = arith.constant 0 : index
      %c0_78 = arith.constant 0 : index
      %362 = vector.load %arg8[%c0_77, %c0_78] : memref<8x128xf32, #tpu.memory_space<vmem>>, vector<8x128xf32>
      tpu.vector_store %arg8[%c0_77, %c0_78], %361 {strides = array<i32>} : memref<8x128xf32, #tpu.memory_space<vmem>>, vector<8x128xf32>,
    } else {
    }
    %c0 = arith.constant 0 : index
    %c0_1 = arith.constant 0 : index
    %3 = vector.load %arg5[%c0, %c0_1] : memref<128x384xf32, #tpu.memory_space<vmem>>, vector<128x384xf32>
    %c0_2 = arith.constant 0 : index
    %c0_3 = arith.constant 0 : index
    %4 = vector.load %arg6[%c0_2, %c0_3] : memref<1x128xf32, #tpu.memory_space<vmem>>, vector<1x128xf32>
    %c0_4 = arith.constant 0 : index
    %c0_5 = arith.constant 0 : index
    %5 = vector.load %arg3[%c0_4, %c0_5] : memref<8x1xi32, #tpu.memory_space<vmem>>, vector<8x1xi32>
    %c8_i32 = arith.constant 8 : i32
    %6 = arith.muli %arg1, %c8_i32 : i32
    %c0_6 = arith.constant 0 : index
    %c0_7 = arith.constant 0 : index
    %7 = vector.load %arg8[%c0_6, %c0_7] : memref<8x128xf32, #tpu.memory_space<vmem>>, vector<8x128xf32>
    %c0_i32_8 = arith.constant 0 : i32
    %8 = arith.index_cast %c0_i32_8 : i32 to index
    %c0_9 = arith.constant 0 : index
    %c0_10 = arith.constant 0 : index
    %9 = vector.load %arg2[%8, %c0_9, %c0_10] : memref<8x8x384xf32, #tpu.memory_space<vmem>>, vector<1x8x384xf32>
    %10 = vector.shape_cast %9 : vector<1x8x384xf32> to vector<8x384xf32>
    %cst = arith.constant dense<0.000000e+00> : vector<8x384xf32>
    %11 = tpu.matmul %7, %3, %cst {dimension_numbers = #tpu.dot_dimension_numbers<[1], [0], [0], [1], [0, 0, 1, 1], [], []>} : vector<8x128xf32>, vector<128x384xf32>, vector<8x384xf32> -> vector<8x384xf32>
    %12 = vector.extract_strided_slice %10 {offsets = [0, 0], sizes = [8, 128], strides = [1, 1]} : vector<8x384xf32> to vector<8x128xf32>
    %13 = vector.extract_strided_slice %11 {offsets = [0, 0], sizes = [8, 128], strides = [1, 1]} : vector<8x384xf32> to vector<8x128xf32>
    %14 = arith.addf %12, %13 : vector<8x128xf32>
    %15 = arith.negf %14 : vector<8x128xf32>
    %16 = math.exp %15 : vector<8x128xf32>
    %cst_11 = arith.constant 1.000000e+00 : f32
    %17 = vector.broadcast %cst_11 : f32 to vector<8x128xf32>
    %18 = arith.addf %17, %16 : vector<8x128xf32>
    %19 = arith.divf %17, %18 : vector<8x128xf32>
    %20 = vector.extract_strided_slice %10 {offsets = [0, 128], sizes = [8, 128], strides = [1, 1]} : vector<8x384xf32> to vector<8x128xf32>
    %21 = vector.extract_strided_slice %11 {offsets = [0, 128], sizes = [8, 128], strides = [1, 1]} : vector<8x384xf32> to vector<8x128xf32>
    %22 = arith.addf %20, %21 : vector<8x128xf32>
    %23 = arith.negf %22 : vector<8x128xf32>
    %24 = math.exp %23 : vector<8x128xf32>
    %cst_12 = arith.constant 1.000000e+00 : f32
    %25 = vector.broadcast %cst_12 : f32 to vector<8x128xf32>
    %26 = arith.addf %25, %24 : vector<8x128xf32>
    %27 = arith.divf %25, %26 : vector<8x128xf32>
    %28 = vector.extract_strided_slice %10 {offsets = [0, 256], sizes = [8, 128], strides = [1, 1]} : vector<8x384xf32> to vector<8x128xf32>
    %29 = vector.extract_strided_slice %11 {offsets = [0, 256], sizes = [8, 128], strides = [1, 1]} : vector<8x384xf32> to vector<8x128xf32>
    %30 = vector.broadcast %4 : vector<1x128xf32> to vector<8x128xf32>
    %31 = arith.addf %29, %30 : vector<8x128xf32>
    %32 = arith.mulf %19, %31 : vector<8x128xf32>
    %33 = arith.addf %28, %32 : vector<8x128xf32>
    %34 = math.tanh %33 : vector<8x128xf32>
    %35 = arith.subf %7, %34 : vector<8x128xf32>
    %36 = arith.mulf %27, %35 : vector<8x128xf32>
    %37 = arith.addf %34, %36 : vector<8x128xf32>
    %38 = arith.addi %6, %c0_i32_8 : i32
    %39 = vector.broadcast %38 : i32 to vector<8x1xi32>
    %40 = arith.cmpi slt, %39, %5 : vector<8x1xi32>
    %cst_13 = arith.constant 0.000000e+00 : f32
    %41 = vector.shape_cast %40 : vector<8x1xi1> to vector<8x1xi1>
    %42 = vector.broadcast %41 : vector<8x1xi1> to vector<8x128xi1>
    %43 = vector.broadcast %cst_13 : f32 to vector<8x128xf32>
    %44 = arith.select %42, %37, %43 : vector<8x128xi1>, vector<8x128xf32>
    %45 = arith.index_cast %c0_i32_8 : i32 to index
    %c0_14 = arith.constant 0 : index
    %c0_15 = arith.constant 0 : index
    %46 = vector.load %arg7[%45, %c0_14, %c0_15] : memref<8x8x128xf32, #tpu.memory_space<vmem>>, vector<1x8x128xf32>
    %47 = vector.shape_cast %46 : vector<1x8x128xf32> to vector<8x128xf32>
    %48 = vector.shape_cast %44 : vector<8x128xf32> to vector<1x8x128xf32>
    tpu.vector_store %arg7[%45, %c0_14, %c0_15], %48 {strides = array<i32>} : memref<8x8x128xf32, #tpu.memory_space<vmem>>, vector<1x8x128xf32>,
    %49 = vector.shape_cast %40 : vector<8x1xi1> to vector<8x1xi1>
    %50 = vector.broadcast %49 : vector<8x1xi1> to vector<8x128xi1>
    %51 = arith.select %50, %37, %7 : vector<8x128xi1>, vector<8x128xf32>
    %c1_i32 = arith.constant 1 : i32
    %52 = arith.index_cast %c1_i32 : i32 to index
    %c0_16 = arith.constant 0 : index
    %c0_17 = arith.constant 0 : index
    %53 = vector.load %arg2[%52, %c0_16, %c0_17] : memref<8x8x384xf32, #tpu.memory_space<vmem>>, vector<1x8x384xf32>
    %54 = vector.shape_cast %53 : vector<1x8x384xf32> to vector<8x384xf32>
    %cst_18 = arith.constant dense<0.000000e+00> : vector<8x384xf32>
    %55 = tpu.matmul %51, %3, %cst_18 {dimension_numbers = #tpu.dot_dimension_numbers<[1], [0], [0], [1], [0, 0, 1, 1], [], []>} : vector<8x128xf32>, vector<128x384xf32>, vector<8x384xf32> -> vector<8x384xf32>
    %56 = vector.extract_strided_slice %54 {offsets = [0, 0], sizes = [8, 128], strides = [1, 1]} : vector<8x384xf32> to vector<8x128xf32>
    %57 = vector.extract_strided_slice %55 {offsets = [0, 0], sizes = [8, 128], strides = [1, 1]} : vector<8x384xf32> to vector<8x128xf32>
    %58 = arith.addf %56, %57 : vector<8x128xf32>
    %59 = arith.negf %58 : vector<8x128xf32>
    %60 = math.exp %59 : vector<8x128xf32>
    %cst_19 = arith.constant 1.000000e+00 : f32
    %61 = vector.broadcast %cst_19 : f32 to vector<8x128xf32>
    %62 = arith.addf %61, %60 : vector<8x128xf32>
    %63 = arith.divf %61, %62 : vector<8x128xf32>
    %64 = vector.extract_strided_slice %54 {offsets = [0, 128], sizes = [8, 128], strides = [1, 1]} : vector<8x384xf32> to vector<8x128xf32>
    %65 = vector.extract_strided_slice %55 {offsets = [0, 128], sizes = [8, 128], strides = [1, 1]} : vector<8x384xf32> to vector<8x128xf32>
    %66 = arith.addf %64, %65 : vector<8x128xf32>
    %67 = arith.negf %66 : vector<8x128xf32>
    %68 = math.exp %67 : vector<8x128xf32>
    %cst_20 = arith.constant 1.000000e+00 : f32
    %69 = vector.broadcast %cst_20 : f32 to vector<8x128xf32>
    %70 = arith.addf %69, %68 : vector<8x128xf32>
    %71 = arith.divf %69, %70 : vector<8x128xf32>
    %72 = vector.extract_strided_slice %54 {offsets = [0, 256], sizes = [8, 128], strides = [1, 1]} : vector<8x384xf32> to vector<8x128xf32>
    %73 = vector.extract_strided_slice %55 {offsets = [0, 256], sizes = [8, 128], strides = [1, 1]} : vector<8x384xf32> to vector<8x128xf32>
    %74 = vector.broadcast %4 : vector<1x128xf32> to vector<8x128xf32>
    %75 = arith.addf %73, %74 : vector<8x128xf32>
    %76 = arith.mulf %63, %75 : vector<8x128xf32>
    %77 = arith.addf %72, %76 : vector<8x128xf32>
    %78 = math.tanh %77 : vector<8x128xf32>
    %79 = arith.subf %51, %78 : vector<8x128xf32>
    %80 = arith.mulf %71, %79 : vector<8x128xf32>
    %81 = arith.addf %78, %80 : vector<8x128xf32>
    %82 = arith.addi %6, %c1_i32 : i32
    %83 = vector.broadcast %82 : i32 to vector<8x1xi32>
    %84 = arith.cmpi slt, %83, %5 : vector<8x1xi32>
    %cst_21 = arith.constant 0.000000e+00 : f32
    %85 = vector.shape_cast %84 : vector<8x1xi1> to vector<8x1xi1>
    %86 = vector.broadcast %85 : vector<8x1xi1> to vector<8x128xi1>
    %87 = vector.broadcast %cst_21 : f32 to vector<8x128xf32>
    %88 = arith.select %86, %81, %87 : vector<8x128xi1>, vector<8x128xf32>
    %89 = arith.index_cast %c1_i32 : i32 to index
    %c0_22 = arith.constant 0 : index
    %c0_23 = arith.constant 0 : index
    %90 = vector.load %arg7[%89, %c0_22, %c0_23] : memref<8x8x128xf32, #tpu.memory_space<vmem>>, vector<1x8x128xf32>
    %91 = vector.shape_cast %90 : vector<1x8x128xf32> to vector<8x128xf32>
    %92 = vector.shape_cast %88 : vector<8x128xf32> to vector<1x8x128xf32>
    tpu.vector_store %arg7[%89, %c0_22, %c0_23], %92 {strides = array<i32>} : memref<8x8x128xf32, #tpu.memory_space<vmem>>, vector<1x8x128xf32>,
    %93 = vector.shape_cast %84 : vector<8x1xi1> to vector<8x1xi1>
    %94 = vector.broadcast %93 : vector<8x1xi1> to vector<8x128xi1>
    %95 = arith.select %94, %81, %51 : vector<8x128xi1>, vector<8x128xf32>
    %c2_i32 = arith.constant 2 : i32
    %96 = arith.index_cast %c2_i32 : i32 to index
    %c0_24 = arith.constant 0 : index
    %c0_25 = arith.constant 0 : index
    %97 = vector.load %arg2[%96, %c0_24, %c0_25] : memref<8x8x384xf32, #tpu.memory_space<vmem>>, vector<1x8x384xf32>
    %98 = vector.shape_cast %97 : vector<1x8x384xf32> to vector<8x384xf32>
    %cst_26 = arith.constant dense<0.000000e+00> : vector<8x384xf32>
    %99 = tpu.matmul %95, %3, %cst_26 {dimension_numbers = #tpu.dot_dimension_numbers<[1], [0], [0], [1], [0, 0, 1, 1], [], []>} : vector<8x128xf32>, vector<128x384xf32>, vector<8x384xf32> -> vector<8x384xf32>
    %100 = vector.extract_strided_slice %98 {offsets = [0, 0], sizes = [8, 128], strides = [1, 1]} : vector<8x384xf32> to vector<8x128xf32>
    %101 = vector.extract_strided_slice %99 {offsets = [0, 0], sizes = [8, 128], strides = [1, 1]} : vector<8x384xf32> to vector<8x128xf32>
    %102 = arith.addf %100, %101 : vector<8x128xf32>
    %103 = arith.negf %102 : vector<8x128xf32>
    %104 = math.exp %103 : vector<8x128xf32>
    %cst_27 = arith.constant 1.000000e+00 : f32
    %105 = vector.broadcast %cst_27 : f32 to vector<8x128xf32>
    %106 = arith.addf %105, %104 : vector<8x128xf32>
    %107 = arith.divf %105, %106 : vector<8x128xf32>
    %108 = vector.extract_strided_slice %98 {offsets = [0, 128], sizes = [8, 128], strides = [1, 1]} : vector<8x384xf32> to vector<8x128xf32>
    %109 = vector.extract_strided_slice %99 {offsets = [0, 128], sizes = [8, 128], strides = [1, 1]} : vector<8x384xf32> to vector<8x128xf32>
    %110 = arith.addf %108, %109 : vector<8x128xf32>
    %111 = arith.negf %110 : vector<8x128xf32>
    %112 = math.exp %111 : vector<8x128xf32>
    %cst_28 = arith.constant 1.000000e+00 : f32
    %113 = vector.broadcast %cst_28 : f32 to vector<8x128xf32>
    %114 = arith.addf %113, %112 : vector<8x128xf32>
    %115 = arith.divf %113, %114 : vector<8x128xf32>
    %116 = vector.extract_strided_slice %98 {offsets = [0, 256], sizes = [8, 128], strides = [1, 1]} : vector<8x384xf32> to vector<8x128xf32>
    %117 = vector.extract_strided_slice %99 {offsets = [0, 256], sizes = [8, 128], strides = [1, 1]} : vector<8x384xf32> to vector<8x128xf32>
    %118 = vector.broadcast %4 : vector<1x128xf32> to vector<8x128xf32>
    %119 = arith.addf %117, %118 : vector<8x128xf32>
    %120 = arith.mulf %107, %119 : vector<8x128xf32>
    %121 = arith.addf %116, %120 : vector<8x128xf32>
    %122 = math.tanh %121 : vector<8x128xf32>
    %123 = arith.subf %95, %122 : vector<8x128xf32>
    %124 = arith.mulf %115, %123 : vector<8x128xf32>
    %125 = arith.addf %122, %124 : vector<8x128xf32>
    %126 = arith.addi %6, %c2_i32 : i32
    %127 = vector.broadcast %126 : i32 to vector<8x1xi32>
    %128 = arith.cmpi slt, %127, %5 : vector<8x1xi32>
    %cst_29 = arith.constant 0.000000e+00 : f32
    %129 = vector.shape_cast %128 : vector<8x1xi1> to vector<8x1xi1>
    %130 = vector.broadcast %129 : vector<8x1xi1> to vector<8x128xi1>
    %131 = vector.broadcast %cst_29 : f32 to vector<8x128xf32>
    %132 = arith.select %130, %125, %131 : vector<8x128xi1>, vector<8x128xf32>
    %133 = arith.index_cast %c2_i32 : i32 to index
    %c0_30 = arith.constant 0 : index
    %c0_31 = arith.constant 0 : index
    %134 = vector.load %arg7[%133, %c0_30, %c0_31] : memref<8x8x128xf32, #tpu.memory_space<vmem>>, vector<1x8x128xf32>
    %135 = vector.shape_cast %134 : vector<1x8x128xf32> to vector<8x128xf32>
    %136 = vector.shape_cast %132 : vector<8x128xf32> to vector<1x8x128xf32>
    tpu.vector_store %arg7[%133, %c0_30, %c0_31], %136 {strides = array<i32>} : memref<8x8x128xf32, #tpu.memory_space<vmem>>, vector<1x8x128xf32>,
    %137 = vector.shape_cast %128 : vector<8x1xi1> to vector<8x1xi1>
    %138 = vector.broadcast %137 : vector<8x1xi1> to vector<8x128xi1>
    %139 = arith.select %138, %125, %95 : vector<8x128xi1>, vector<8x128xf32>
    %c3_i32 = arith.constant 3 : i32
    %140 = arith.index_cast %c3_i32 : i32 to index
    %c0_32 = arith.constant 0 : index
    %c0_33 = arith.constant 0 : index
    %141 = vector.load %arg2[%140, %c0_32, %c0_33] : memref<8x8x384xf32, #tpu.memory_space<vmem>>, vector<1x8x384xf32>
    %142 = vector.shape_cast %141 : vector<1x8x384xf32> to vector<8x384xf32>
    %cst_34 = arith.constant dense<0.000000e+00> : vector<8x384xf32>
    %143 = tpu.matmul %139, %3, %cst_34 {dimension_numbers = #tpu.dot_dimension_numbers<[1], [0], [0], [1], [0, 0, 1, 1], [], []>} : vector<8x128xf32>, vector<128x384xf32>, vector<8x384xf32> -> vector<8x384xf32>
    %144 = vector.extract_strided_slice %142 {offsets = [0, 0], sizes = [8, 128], strides = [1, 1]} : vector<8x384xf32> to vector<8x128xf32>
    %145 = vector.extract_strided_slice %143 {offsets = [0, 0], sizes = [8, 128], strides = [1, 1]} : vector<8x384xf32> to vector<8x128xf32>
    %146 = arith.addf %144, %145 : vector<8x128xf32>
    %147 = arith.negf %146 : vector<8x128xf32>
    %148 = math.exp %147 : vector<8x128xf32>
    %cst_35 = arith.constant 1.000000e+00 : f32
    %149 = vector.broadcast %cst_35 : f32 to vector<8x128xf32>
    %150 = arith.addf %149, %148 : vector<8x128xf32>
    %151 = arith.divf %149, %150 : vector<8x128xf32>
    %152 = vector.extract_strided_slice %142 {offsets = [0, 128], sizes = [8, 128], strides = [1, 1]} : vector<8x384xf32> to vector<8x128xf32>
    %153 = vector.extract_strided_slice %143 {offsets = [0, 128], sizes = [8, 128], strides = [1, 1]} : vector<8x384xf32> to vector<8x128xf32>
    %154 = arith.addf %152, %153 : vector<8x128xf32>
    %155 = arith.negf %154 : vector<8x128xf32>
    %156 = math.exp %155 : vector<8x128xf32>
    %cst_36 = arith.constant 1.000000e+00 : f32
    %157 = vector.broadcast %cst_36 : f32 to vector<8x128xf32>
    %158 = arith.addf %157, %156 : vector<8x128xf32>
    %159 = arith.divf %157, %158 : vector<8x128xf32>
    %160 = vector.extract_strided_slice %142 {offsets = [0, 256], sizes = [8, 128], strides = [1, 1]} : vector<8x384xf32> to vector<8x128xf32>
    %161 = vector.extract_strided_slice %143 {offsets = [0, 256], sizes = [8, 128], strides = [1, 1]} : vector<8x384xf32> to vector<8x128xf32>
    %162 = vector.broadcast %4 : vector<1x128xf32> to vector<8x128xf32>
    %163 = arith.addf %161, %162 : vector<8x128xf32>
    %164 = arith.mulf %151, %163 : vector<8x128xf32>
    %165 = arith.addf %160, %164 : vector<8x128xf32>
    %166 = math.tanh %165 : vector<8x128xf32>
    %167 = arith.subf %139, %166 : vector<8x128xf32>
    %168 = arith.mulf %159, %167 : vector<8x128xf32>
    %169 = arith.addf %166, %168 : vector<8x128xf32>
    %170 = arith.addi %6, %c3_i32 : i32
    %171 = vector.broadcast %170 : i32 to vector<8x1xi32>
    %172 = arith.cmpi slt, %171, %5 : vector<8x1xi32>
    %cst_37 = arith.constant 0.000000e+00 : f32
    %173 = vector.shape_cast %172 : vector<8x1xi1> to vector<8x1xi1>
    %174 = vector.broadcast %173 : vector<8x1xi1> to vector<8x128xi1>
    %175 = vector.broadcast %cst_37 : f32 to vector<8x128xf32>
    %176 = arith.select %174, %169, %175 : vector<8x128xi1>, vector<8x128xf32>
    %177 = arith.index_cast %c3_i32 : i32 to index
    %c0_38 = arith.constant 0 : index
    %c0_39 = arith.constant 0 : index
    %178 = vector.load %arg7[%177, %c0_38, %c0_39] : memref<8x8x128xf32, #tpu.memory_space<vmem>>, vector<1x8x128xf32>
    %179 = vector.shape_cast %178 : vector<1x8x128xf32> to vector<8x128xf32>
    %180 = vector.shape_cast %176 : vector<8x128xf32> to vector<1x8x128xf32>
    tpu.vector_store %arg7[%177, %c0_38, %c0_39], %180 {strides = array<i32>} : memref<8x8x128xf32, #tpu.memory_space<vmem>>, vector<1x8x128xf32>,
    %181 = vector.shape_cast %172 : vector<8x1xi1> to vector<8x1xi1>
    %182 = vector.broadcast %181 : vector<8x1xi1> to vector<8x128xi1>
    %183 = arith.select %182, %169, %139 : vector<8x128xi1>, vector<8x128xf32>
    %c4_i32 = arith.constant 4 : i32
    %184 = arith.index_cast %c4_i32 : i32 to index
    %c0_40 = arith.constant 0 : index
    %c0_41 = arith.constant 0 : index
    %185 = vector.load %arg2[%184, %c0_40, %c0_41] : memref<8x8x384xf32, #tpu.memory_space<vmem>>, vector<1x8x384xf32>
    %186 = vector.shape_cast %185 : vector<1x8x384xf32> to vector<8x384xf32>
    %cst_42 = arith.constant dense<0.000000e+00> : vector<8x384xf32>
    %187 = tpu.matmul %183, %3, %cst_42 {dimension_numbers = #tpu.dot_dimension_numbers<[1], [0], [0], [1], [0, 0, 1, 1], [], []>} : vector<8x128xf32>, vector<128x384xf32>, vector<8x384xf32> -> vector<8x384xf32>
    %188 = vector.extract_strided_slice %186 {offsets = [0, 0], sizes = [8, 128], strides = [1, 1]} : vector<8x384xf32> to vector<8x128xf32>
    %189 = vector.extract_strided_slice %187 {offsets = [0, 0], sizes = [8, 128], strides = [1, 1]} : vector<8x384xf32> to vector<8x128xf32>
    %190 = arith.addf %188, %189 : vector<8x128xf32>
    %191 = arith.negf %190 : vector<8x128xf32>
    %192 = math.exp %191 : vector<8x128xf32>
    %cst_43 = arith.constant 1.000000e+00 : f32
    %193 = vector.broadcast %cst_43 : f32 to vector<8x128xf32>
    %194 = arith.addf %193, %192 : vector<8x128xf32>
    %195 = arith.divf %193, %194 : vector<8x128xf32>
    %196 = vector.extract_strided_slice %186 {offsets = [0, 128], sizes = [8, 128], strides = [1, 1]} : vector<8x384xf32> to vector<8x128xf32>
    %197 = vector.extract_strided_slice %187 {offsets = [0, 128], sizes = [8, 128], strides = [1, 1]} : vector<8x384xf32> to vector<8x128xf32>
    %198 = arith.addf %196, %197 : vector<8x128xf32>
    %199 = arith.negf %198 : vector<8x128xf32>
    %200 = math.exp %199 : vector<8x128xf32>
    %cst_44 = arith.constant 1.000000e+00 : f32
    %201 = vector.broadcast %cst_44 : f32 to vector<8x128xf32>
    %202 = arith.addf %201, %200 : vector<8x128xf32>
    %203 = arith.divf %201, %202 : vector<8x128xf32>
    %204 = vector.extract_strided_slice %186 {offsets = [0, 256], sizes = [8, 128], strides = [1, 1]} : vector<8x384xf32> to vector<8x128xf32>
    %205 = vector.extract_strided_slice %187 {offsets = [0, 256], sizes = [8, 128], strides = [1, 1]} : vector<8x384xf32> to vector<8x128xf32>
    %206 = vector.broadcast %4 : vector<1x128xf32> to vector<8x128xf32>
    %207 = arith.addf %205, %206 : vector<8x128xf32>
    %208 = arith.mulf %195, %207 : vector<8x128xf32>
    %209 = arith.addf %204, %208 : vector<8x128xf32>
    %210 = math.tanh %209 : vector<8x128xf32>
    %211 = arith.subf %183, %210 : vector<8x128xf32>
    %212 = arith.mulf %203, %211 : vector<8x128xf32>
    %213 = arith.addf %210, %212 : vector<8x128xf32>
    %214 = arith.addi %6, %c4_i32 : i32
    %215 = vector.broadcast %214 : i32 to vector<8x1xi32>
    %216 = arith.cmpi slt, %215, %5 : vector<8x1xi32>
    %cst_45 = arith.constant 0.000000e+00 : f32
    %217 = vector.shape_cast %216 : vector<8x1xi1> to vector<8x1xi1>
    %218 = vector.broadcast %217 : vector<8x1xi1> to vector<8x128xi1>
    %219 = vector.broadcast %cst_45 : f32 to vector<8x128xf32>
    %220 = arith.select %218, %213, %219 : vector<8x128xi1>, vector<8x128xf32>
    %221 = arith.index_cast %c4_i32 : i32 to index
    %c0_46 = arith.constant 0 : index
    %c0_47 = arith.constant 0 : index
    %222 = vector.load %arg7[%221, %c0_46, %c0_47] : memref<8x8x128xf32, #tpu.memory_space<vmem>>, vector<1x8x128xf32>
    %223 = vector.shape_cast %222 : vector<1x8x128xf32> to vector<8x128xf32>
    %224 = vector.shape_cast %220 : vector<8x128xf32> to vector<1x8x128xf32>
    tpu.vector_store %arg7[%221, %c0_46, %c0_47], %224 {strides = array<i32>} : memref<8x8x128xf32, #tpu.memory_space<vmem>>, vector<1x8x128xf32>,
    %225 = vector.shape_cast %216 : vector<8x1xi1> to vector<8x1xi1>
    %226 = vector.broadcast %225 : vector<8x1xi1> to vector<8x128xi1>
    %227 = arith.select %226, %213, %183 : vector<8x128xi1>, vector<8x128xf32>
    %c5_i32 = arith.constant 5 : i32
    %228 = arith.index_cast %c5_i32 : i32 to index
    %c0_48 = arith.constant 0 : index
    %c0_49 = arith.constant 0 : index
    %229 = vector.load %arg2[%228, %c0_48, %c0_49] : memref<8x8x384xf32, #tpu.memory_space<vmem>>, vector<1x8x384xf32>
    %230 = vector.shape_cast %229 : vector<1x8x384xf32> to vector<8x384xf32>
    %cst_50 = arith.constant dense<0.000000e+00> : vector<8x384xf32>
    %231 = tpu.matmul %227, %3, %cst_50 {dimension_numbers = #tpu.dot_dimension_numbers<[1], [0], [0], [1], [0, 0, 1, 1], [], []>} : vector<8x128xf32>, vector<128x384xf32>, vector<8x384xf32> -> vector<8x384xf32>
    %232 = vector.extract_strided_slice %230 {offsets = [0, 0], sizes = [8, 128], strides = [1, 1]} : vector<8x384xf32> to vector<8x128xf32>
    %233 = vector.extract_strided_slice %231 {offsets = [0, 0], sizes = [8, 128], strides = [1, 1]} : vector<8x384xf32> to vector<8x128xf32>
    %234 = arith.addf %232, %233 : vector<8x128xf32>
    %235 = arith.negf %234 : vector<8x128xf32>
    %236 = math.exp %235 : vector<8x128xf32>
    %cst_51 = arith.constant 1.000000e+00 : f32
    %237 = vector.broadcast %cst_51 : f32 to vector<8x128xf32>
    %238 = arith.addf %237, %236 : vector<8x128xf32>
    %239 = arith.divf %237, %238 : vector<8x128xf32>
    %240 = vector.extract_strided_slice %230 {offsets = [0, 128], sizes = [8, 128], strides = [1, 1]} : vector<8x384xf32> to vector<8x128xf32>
    %241 = vector.extract_strided_slice %231 {offsets = [0, 128], sizes = [8, 128], strides = [1, 1]} : vector<8x384xf32> to vector<8x128xf32>
    %242 = arith.addf %240, %241 : vector<8x128xf32>
    %243 = arith.negf %242 : vector<8x128xf32>
    %244 = math.exp %243 : vector<8x128xf32>
    %cst_52 = arith.constant 1.000000e+00 : f32
    %245 = vector.broadcast %cst_52 : f32 to vector<8x128xf32>
    %246 = arith.addf %245, %244 : vector<8x128xf32>
    %247 = arith.divf %245, %246 : vector<8x128xf32>
    %248 = vector.extract_strided_slice %230 {offsets = [0, 256], sizes = [8, 128], strides = [1, 1]} : vector<8x384xf32> to vector<8x128xf32>
    %249 = vector.extract_strided_slice %231 {offsets = [0, 256], sizes = [8, 128], strides = [1, 1]} : vector<8x384xf32> to vector<8x128xf32>
    %250 = vector.broadcast %4 : vector<1x128xf32> to vector<8x128xf32>
    %251 = arith.addf %249, %250 : vector<8x128xf32>
    %252 = arith.mulf %239, %251 : vector<8x128xf32>
    %253 = arith.addf %248, %252 : vector<8x128xf32>
    %254 = math.tanh %253 : vector<8x128xf32>
    %255 = arith.subf %227, %254 : vector<8x128xf32>
    %256 = arith.mulf %247, %255 : vector<8x128xf32>
    %257 = arith.addf %254, %256 : vector<8x128xf32>
    %258 = arith.addi %6, %c5_i32 : i32
    %259 = vector.broadcast %258 : i32 to vector<8x1xi32>
    %260 = arith.cmpi slt, %259, %5 : vector<8x1xi32>
    %cst_53 = arith.constant 0.000000e+00 : f32
    %261 = vector.shape_cast %260 : vector<8x1xi1> to vector<8x1xi1>
    %262 = vector.broadcast %261 : vector<8x1xi1> to vector<8x128xi1>
    %263 = vector.broadcast %cst_53 : f32 to vector<8x128xf32>
    %264 = arith.select %262, %257, %263 : vector<8x128xi1>, vector<8x128xf32>
    %265 = arith.index_cast %c5_i32 : i32 to index
    %c0_54 = arith.constant 0 : index
    %c0_55 = arith.constant 0 : index
    %266 = vector.load %arg7[%265, %c0_54, %c0_55] : memref<8x8x128xf32, #tpu.memory_space<vmem>>, vector<1x8x128xf32>
    %267 = vector.shape_cast %266 : vector<1x8x128xf32> to vector<8x128xf32>
    %268 = vector.shape_cast %264 : vector<8x128xf32> to vector<1x8x128xf32>
    tpu.vector_store %arg7[%265, %c0_54, %c0_55], %268 {strides = array<i32>} : memref<8x8x128xf32, #tpu.memory_space<vmem>>, vector<1x8x128xf32>,
    %269 = vector.shape_cast %260 : vector<8x1xi1> to vector<8x1xi1>
    %270 = vector.broadcast %269 : vector<8x1xi1> to vector<8x128xi1>
    %271 = arith.select %270, %257, %227 : vector<8x128xi1>, vector<8x128xf32>
    %c6_i32 = arith.constant 6 : i32
    %272 = arith.index_cast %c6_i32 : i32 to index
    %c0_56 = arith.constant 0 : index
    %c0_57 = arith.constant 0 : index
    %273 = vector.load %arg2[%272, %c0_56, %c0_57] : memref<8x8x384xf32, #tpu.memory_space<vmem>>, vector<1x8x384xf32>
    %274 = vector.shape_cast %273 : vector<1x8x384xf32> to vector<8x384xf32>
    %cst_58 = arith.constant dense<0.000000e+00> : vector<8x384xf32>
    %275 = tpu.matmul %271, %3, %cst_58 {dimension_numbers = #tpu.dot_dimension_numbers<[1], [0], [0], [1], [0, 0, 1, 1], [], []>} : vector<8x128xf32>, vector<128x384xf32>, vector<8x384xf32> -> vector<8x384xf32>
    %276 = vector.extract_strided_slice %274 {offsets = [0, 0], sizes = [8, 128], strides = [1, 1]} : vector<8x384xf32> to vector<8x128xf32>
    %277 = vector.extract_strided_slice %275 {offsets = [0, 0], sizes = [8, 128], strides = [1, 1]} : vector<8x384xf32> to vector<8x128xf32>
    %278 = arith.addf %276, %277 : vector<8x128xf32>
    %279 = arith.negf %278 : vector<8x128xf32>
    %280 = math.exp %279 : vector<8x128xf32>
    %cst_59 = arith.constant 1.000000e+00 : f32
    %281 = vector.broadcast %cst_59 : f32 to vector<8x128xf32>
    %282 = arith.addf %281, %280 : vector<8x128xf32>
    %283 = arith.divf %281, %282 : vector<8x128xf32>
    %284 = vector.extract_strided_slice %274 {offsets = [0, 128], sizes = [8, 128], strides = [1, 1]} : vector<8x384xf32> to vector<8x128xf32>
    %285 = vector.extract_strided_slice %275 {offsets = [0, 128], sizes = [8, 128], strides = [1, 1]} : vector<8x384xf32> to vector<8x128xf32>
    %286 = arith.addf %284, %285 : vector<8x128xf32>
    %287 = arith.negf %286 : vector<8x128xf32>
    %288 = math.exp %287 : vector<8x128xf32>
    %cst_60 = arith.constant 1.000000e+00 : f32
    %289 = vector.broadcast %cst_60 : f32 to vector<8x128xf32>
    %290 = arith.addf %289, %288 : vector<8x128xf32>
    %291 = arith.divf %289, %290 : vector<8x128xf32>
    %292 = vector.extract_strided_slice %274 {offsets = [0, 256], sizes = [8, 128], strides = [1, 1]} : vector<8x384xf32> to vector<8x128xf32>
    %293 = vector.extract_strided_slice %275 {offsets = [0, 256], sizes = [8, 128], strides = [1, 1]} : vector<8x384xf32> to vector<8x128xf32>
    %294 = vector.broadcast %4 : vector<1x128xf32> to vector<8x128xf32>
    %295 = arith.addf %293, %294 : vector<8x128xf32>
    %296 = arith.mulf %283, %295 : vector<8x128xf32>
    %297 = arith.addf %292, %296 : vector<8x128xf32>
    %298 = math.tanh %297 : vector<8x128xf32>
    %299 = arith.subf %271, %298 : vector<8x128xf32>
    %300 = arith.mulf %291, %299 : vector<8x128xf32>
    %301 = arith.addf %298, %300 : vector<8x128xf32>
    %302 = arith.addi %6, %c6_i32 : i32
    %303 = vector.broadcast %302 : i32 to vector<8x1xi32>
    %304 = arith.cmpi slt, %303, %5 : vector<8x1xi32>
    %cst_61 = arith.constant 0.000000e+00 : f32
    %305 = vector.shape_cast %304 : vector<8x1xi1> to vector<8x1xi1>
    %306 = vector.broadcast %305 : vector<8x1xi1> to vector<8x128xi1>
    %307 = vector.broadcast %cst_61 : f32 to vector<8x128xf32>
    %308 = arith.select %306, %301, %307 : vector<8x128xi1>, vector<8x128xf32>
    %309 = arith.index_cast %c6_i32 : i32 to index
    %c0_62 = arith.constant 0 : index
    %c0_63 = arith.constant 0 : index
    %310 = vector.load %arg7[%309, %c0_62, %c0_63] : memref<8x8x128xf32, #tpu.memory_space<vmem>>, vector<1x8x128xf32>
    %311 = vector.shape_cast %310 : vector<1x8x128xf32> to vector<8x128xf32>
    %312 = vector.shape_cast %308 : vector<8x128xf32> to vector<1x8x128xf32>
    tpu.vector_store %arg7[%309, %c0_62, %c0_63], %312 {strides = array<i32>} : memref<8x8x128xf32, #tpu.memory_space<vmem>>, vector<1x8x128xf32>,
    %313 = vector.shape_cast %304 : vector<8x1xi1> to vector<8x1xi1>
    %314 = vector.broadcast %313 : vector<8x1xi1> to vector<8x128xi1>
    %315 = arith.select %314, %301, %271 : vector<8x128xi1>, vector<8x128xf32>
    %c7_i32 = arith.constant 7 : i32
    %316 = arith.index_cast %c7_i32 : i32 to index
    %c0_64 = arith.constant 0 : index
    %c0_65 = arith.constant 0 : index
    %317 = vector.load %arg2[%316, %c0_64, %c0_65] : memref<8x8x384xf32, #tpu.memory_space<vmem>>, vector<1x8x384xf32>
    %318 = vector.shape_cast %317 : vector<1x8x384xf32> to vector<8x384xf32>
    %cst_66 = arith.constant dense<0.000000e+00> : vector<8x384xf32>
    %319 = tpu.matmul %315, %3, %cst_66 {dimension_numbers = #tpu.dot_dimension_numbers<[1], [0], [0], [1], [0, 0, 1, 1], [], []>} : vector<8x128xf32>, vector<128x384xf32>, vector<8x384xf32> -> vector<8x384xf32>
    %320 = vector.extract_strided_slice %318 {offsets = [0, 0], sizes = [8, 128], strides = [1, 1]} : vector<8x384xf32> to vector<8x128xf32>
    %321 = vector.extract_strided_slice %319 {offsets = [0, 0], sizes = [8, 128], strides = [1, 1]} : vector<8x384xf32> to vector<8x128xf32>
    %322 = arith.addf %320, %321 : vector<8x128xf32>
    %323 = arith.negf %322 : vector<8x128xf32>
    %324 = math.exp %323 : vector<8x128xf32>
    %cst_67 = arith.constant 1.000000e+00 : f32
    %325 = vector.broadcast %cst_67 : f32 to vector<8x128xf32>
    %326 = arith.addf %325, %324 : vector<8x128xf32>
    %327 = arith.divf %325, %326 : vector<8x128xf32>
    %328 = vector.extract_strided_slice %318 {offsets = [0, 128], sizes = [8, 128], strides = [1, 1]} : vector<8x384xf32> to vector<8x128xf32>
    %329 = vector.extract_strided_slice %319 {offsets = [0, 128], sizes = [8, 128], strides = [1, 1]} : vector<8x384xf32> to vector<8x128xf32>
    %330 = arith.addf %328, %329 : vector<8x128xf32>
    %331 = arith.negf %330 : vector<8x128xf32>
    %332 = math.exp %331 : vector<8x128xf32>
    %cst_68 = arith.constant 1.000000e+00 : f32
    %333 = vector.broadcast %cst_68 : f32 to vector<8x128xf32>
    %334 = arith.addf %333, %332 : vector<8x128xf32>
    %335 = arith.divf %333, %334 : vector<8x128xf32>
    %336 = vector.extract_strided_slice %318 {offsets = [0, 256], sizes = [8, 128], strides = [1, 1]} : vector<8x384xf32> to vector<8x128xf32>
    %337 = vector.extract_strided_slice %319 {offsets = [0, 256], sizes = [8, 128], strides = [1, 1]} : vector<8x384xf32> to vector<8x128xf32>
    %338 = vector.broadcast %4 : vector<1x128xf32> to vector<8x128xf32>
    %339 = arith.addf %337, %338 : vector<8x128xf32>
    %340 = arith.mulf %327, %339 : vector<8x128xf32>
    %341 = arith.addf %336, %340 : vector<8x128xf32>
    %342 = math.tanh %341 : vector<8x128xf32>
    %343 = arith.subf %315, %342 : vector<8x128xf32>
    %344 = arith.mulf %335, %343 : vector<8x128xf32>
    %345 = arith.addf %342, %344 : vector<8x128xf32>
    %346 = arith.addi %6, %c7_i32 : i32
    %347 = vector.broadcast %346 : i32 to vector<8x1xi32>
    %348 = arith.cmpi slt, %347, %5 : vector<8x1xi32>
    %cst_69 = arith.constant 0.000000e+00 : f32
    %349 = vector.shape_cast %348 : vector<8x1xi1> to vector<8x1xi1>
    %350 = vector.broadcast %349 : vector<8x1xi1> to vector<8x128xi1>
    %351 = vector.broadcast %cst_69 : f32 to vector<8x128xf32>
    %352 = arith.select %350, %345, %351 : vector<8x128xi1>, vector<8x128xf32>
    %353 = arith.index_cast %c7_i32 : i32 to index
    %c0_70 = arith.constant 0 : index
    %c0_71 = arith.constant 0 : index
    %354 = vector.load %arg7[%353, %c0_70, %c0_71] : memref<8x8x128xf32, #tpu.memory_space<vmem>>, vector<1x8x128xf32>
    %355 = vector.shape_cast %354 : vector<1x8x128xf32> to vector<8x128xf32>
    %356 = vector.shape_cast %352 : vector<8x128xf32> to vector<1x8x128xf32>
    tpu.vector_store %arg7[%353, %c0_70, %c0_71], %356 {strides = array<i32>} : memref<8x8x128xf32, #tpu.memory_space<vmem>>, vector<1x8x128xf32>,
    %357 = vector.shape_cast %348 : vector<8x1xi1> to vector<8x1xi1>
    %358 = vector.broadcast %357 : vector<8x1xi1> to vector<8x128xi1>
    %359 = arith.select %358, %345, %315 : vector<8x128xi1>, vector<8x128xf32>
    %c8_i32_72 = arith.constant 8 : i32
    %c0_73 = arith.constant 0 : index
    %c0_74 = arith.constant 0 : index
    %360 = vector.load %arg8[%c0_73, %c0_74] : memref<8x128xf32, #tpu.memory_space<vmem>>, vector<8x128xf32>
    tpu.vector_store %arg8[%c0_73, %c0_74], %359 {strides = array<i32>} : memref<8x128xf32, #tpu.memory_space<vmem>>, vector<8x128xf32>,
    return
  }
  func.func @transform_0(%arg0: i32, %arg1: i32) -> (i32, i32, i32) {
    %c0_i32 = arith.constant 0 : i32
    %c0_i32_0 = arith.constant 0 : i32
    return %arg1, %arg0, %c0_i32 : i32, i32, i32
  }
  func.func @transform_1(%arg0: i32, %arg1: i32) -> (i32, i32) {
    %c0_i32 = arith.constant 0 : i32
    %c0_i32_0 = arith.constant 0 : i32
    return %arg0, %c0_i32 : i32, i32
  }
  func.func @transform_2(%arg0: i32, %arg1: i32) -> (i32, i32) {
    %c0_i32 = arith.constant 0 : i32
    %c0_i32_0 = arith.constant 0 : i32
    return %arg0, %c0_i32 : i32, i32
  }
  func.func @transform_3(%arg0: i32, %arg1: i32) -> (i32, i32) {
    %c0_i32 = arith.constant 0 : i32
    %c0_i32_0 = arith.constant 0 : i32
    %c0_i32_1 = arith.constant 0 : i32
    return %c0_i32, %c0_i32_0 : i32, i32
  }
  func.func @transform_4(%arg0: i32, %arg1: i32) -> (i32, i32) {
    %c0_i32 = arith.constant 0 : i32
    %c0_i32_0 = arith.constant 0 : i32
    %c0_i32_1 = arith.constant 0 : i32
    return %c0_i32, %c0_i32_0 : i32, i32
  }
  func.func @transform_5(%arg0: i32, %arg1: i32) -> (i32, i32, i32) {
    %c0_i32 = arith.constant 0 : i32
    %c0_i32_0 = arith.constant 0 : i32
    return %arg1, %arg0, %c0_i32 : i32, i32, i32
  }
  func.func @transform_6(%arg0: i32, %arg1: i32) -> (i32, i32) {
    %c0_i32 = arith.constant 0 : i32
    %c0_i32_0 = arith.constant 0 : i32
    return %arg0, %c0_i32 : i32, i32
  }
}

</mosaic_0001>

<bundles_post_ra>
// kernel: tpu_custom_call.1
= control target key start
LH: loop header
LB: loop body
LE: loop exit
PB: predicated region body
PF: predicated region fallthrough
CT: control target
= control target key end

     0   :  { %s2932_s0 = inlined_call_operand.hbm [shape: f32[16,8,384], index: 0, kind: input, shape index: {}]   ;;  %s2933_s1 = inlined_call_operand.vmem [shape: s32[8,1], index: 1, kind: input, shape index: {}]   ;;  %s2934_s2 = inlined_call_operand.vmem [shape: f32[8,128], index: 2, kind: input, shape index: {}]   ;;  %s2935_s3 = inlined_call_operand.hbm [shape: f32[128,384], index: 3, kind: input, shape index: {}]   ;;  %s2936_s4 = inlined_call_operand.vmem [shape: f32[1,128], index: 4, kind: input, shape index: {}]   ;;  %s2937_s5 = inlined_call_operand.hbm [shape: f32[16,8,128], index: 5, kind: output, shape index: {0}]   ;;  %s2938_s6 = inlined_call_operand.hbm [shape: f32[8,128], index: 6, kind: output, shape index: {1}]  }
   0x1   :  { %2968 = sst [smem:[#allocation28_spill]] %s2935_s3 }
   0x2   :  { %12 = vsyncpa [#allocation3], 0 }
   0x3   :  { %14 = vsyncpa [#allocation3 + $0x1], 0 }
   0x4   :  { %15 = vsyncpa [#allocation6], 0 }
   0x5   :  { %16 = vsyncpa [#allocation4], 0 }
   0x6   :  { %18 = vsyncpa [#allocation4 + $0x1], 0 }
   0x7   :  { %19 = vsyncpa [#allocation9], 0  ;;  %s2073_s21 = smov 0   ;;  %s2075_s22 = smov 0  }
   0x8   :  { %s2077_s23 = smov 0   ;;  %s2079_s24 = smov 0  }
   0x9   :  { %s2081_s25 = smov 0   ;;  %s2083_s26 = smov 0  }
   0xa LB: > { %2969 = sst [smem:[#allocation14_spill]] %s2009_s21  ;;  %s1562_s27 = sadd.s32 4294967295, %s2029_s26   ;;  %s2029_s26 = sphi %s2083_s26, %s25_s26   ;;  %s2025_s25 = sphi %s2081_s25, %s3018_s25   ;;  %s2021_s24 = sphi %s2079_s24, %s3017_s24   ;;  %s2017_s23 = sphi %s2077_s23, %s3016_s23   ;;  %s2013_s22 = sphi %s2075_s22, %s3015_s22   ;;  %s2009_s21 = sphi %s2073_s21, %s3014_s21  }
   0xb   : > { %s1563_s28 = sadd.s32 4294967294, %s2029_s26   ;;  %p59_p0 = scmp.ne.s32.totalorder %s2013_s22, %s2009_s21 }
   0xc   : > { %p2107_p1 = scmp.eq.s32.totalorder %s1562_s27, 0  ;;  %p2111_p2 = scmp.eq.s32.totalorder %s1562_s27, 1 }
   0xd   : > { %p185_p3 = scmp.eq.s32.totalorder %s1563_s28, 1  ;;  %p1564_p5 = scmp.ge.s32.totalorder %s2029_s26, 1 }
   0xe   : > { %p2117_p4 = por %p2107_p1, %p59_p0  ;;  %p218_p7 = scmp.lt.s32.totalorder %s2029_s26, 3 }
   0xf   : > { %p2122_p6 = por %p185_p3, %p59_p0  ;;  %s2975_s3 = sld [smem:[#allocation28_spill]] }
  0x10   : > { %p2130_p8 = pnand %p1564_p5, %p218_p7  ;;  %s2031_s13 = smov [#allocation5]  }
  0x11   : > { %s2973_s8 = scalar_select %p2122_p6, 1, 0 }
  0x12   : > { %p1644_p9 = pneg %p2130_p8  ;;  %s245_s14 = sshll.u32 %s2031_s13, 4  ;;  %s246_s14 = int_to_ptr.vmem [resolvable:$true] %s245_s14 }
  0x13   : > { %2974 = sst [smem:[#allocation15_spill]] %s2973_s8  ;;  %p1568_p11 = scmp.ge.s32.totalorder %s2029_s26, 2 }
  0x14   : > { %p1645_p10 = pnand %p1644_p9, %p2107_p1  ;;  %s2939_s15 = smov 384  }
  0x15   : > { %s243_s11 = sshll.u32 %s2975_s3, 4  ;;  %s2940_s16 = smov 24   ;;  %s244_s11 = int_to_ptr.hbm [resolvable:$true] %s243_s11 }
  0x16   : > { %1647 = dma.hbm_to_vmem [thread:$0]  (!%p1645_p10), %s244_s11, 6144, %s246_s14, [#allocation6], %s2939_s15, %s2939_s15, %s2940_s16  }
  0x17   : > { %s34_s17 = sadd.s32 1, %s2025_s25  ;;  %s46_s18 = sadd.s32 1, %s2017_s23 }
  0x18   : > { %p35_p12 = scmp.ge.s32.totalorder %s34_s17, 2  ;;  %p53_p13 = scmp.ne.s32.totalorder %s2017_s23, %s2013_s22 }
  0x19   : > { %p54_p0 = scmp.eq.s32.totalorder %s2029_s26, 0  ;;  %p1657_p7 = scmp.lt.s32.totalorder %s2029_s26, 2 }
  0x1a   : > { %s3020_s17 = smov (%p35_p12, %s34_s17), 0  ;;  %p2151_p5 = por %p2111_p2, %p53_p13 }
  0x1b   : > { %2977 = sst [smem:[#allocation16_spill]] %s3020_s17  ;;  %p55_p3 = por %p54_p0, %p53_p13 }
  0x1c   : > { %s41_s20 = ssub.s32 %s2025_s25, %s3020_s17  ;;  %s262_s27 = sand.u32 1, %s2017_s23  }
  0x1d   : > { %p44_p9 = scmp.eq.s32.totalorder %s41_s20, 0  ;;  %s1629_s28 = smul.u32 192, %s262_s27 }
  0x1e   : > { %s1630_s10 = smul.u32 192, %s2025_s25  ;;  %p1649_p10 = pnand %p1657_p7, %p55_p3 }
  0x1f   : > { %s2160_s9 = scalar_select %p44_p9, %s2017_s23, %s46_s18  }
  0x20   : > { %s266_s11 = scalar_lea.vmem [#allocation2], %s1629_s28  ;;  %s274_s16 = scalar_lea.hbm %s2932_s0, %s1630_s10 }
  0x21   : > { %s277_s13 = sshll.u32 %s266_s11, 4  ;;  %s275_s3 = sshll.u32 %s274_s16, 4  ;;  %s278_s13 = int_to_ptr.vmem [resolvable:$true] %s277_s13  ;;  %s276_s3 = int_to_ptr.hbm [resolvable:$true] %s275_s3 }
  0x22   : > { %s263_s8 = scalar_lea.sflag [#allocation3], %s262_s27  ;;  %s2979_s21 = smov 24  }
  0x23   : > { %s2980_s17 = smov 384   ;;  %289 = sbr.rel (%p2130_p8) target bundleno = 1511 (0x5e7), region = 40 }
  0x24   : > { %1651 = dma.hbm_to_vmem [thread:$0]  (!%p1649_p10), %s276_s3, 3072, %s278_s13, %s263_s8, %s2980_s17, %s2980_s17, %s2979_s21  }
  0x28   : > { %s2172_s18 = sand.u32 1, %s2013_s22  }
  0x29   : > { %s1631_s20 = smul.u32 192, %s2172_s18  ;;  %s292_s15 = scalar_lea.sflag [#allocation3], %s2172_s18 }
  0x2b   : > { %s2176_s28 = scalar_lea.vmem [#allocation2], %s1631_s20 }
  0x2c   : > { %1992 = dma.done.wait (%p2117_p4), %s292_s15, 3072  }
  0x2d   : > { %1994 = vsyncadd (%p2117_p4), %s292_s15, 4294964224 }
  0x2e   : > { %1996 = dma.done.wait (%p2107_p1), [#allocation6], 6144  }
  0x2f   : > { %1998 = vsyncadd (%p2107_p1), [#allocation6], 4294961152  ;;  %s1574_s3 = sshll.u32 %s2172_s18, 6  ;;  %p1575_p8 = scmp.ne.s32.totalorder %s2021_s24, 0 }
  0x30   : > { %s2187_s21 = scalar_lea.vmem [#allocation7], %s1574_s3 }
  0x31   : > { %351 = sbr.rel (%p1575_p8) target bundleno = 56 (0x38), region = 52 }
  0x36   : > { %v352_v0 = vld [vmem:[%s2934_s2] sm:$0xff] }
  0x37   : > { %353 = vst [vmem:[#allocation8] sm:$0xff] %v352_v0 }
  0x38 PF: > { %v2193_v1 = vld [vmem:[#allocation5 + $0x168] sm:$0xff]  ;;  %v2195_v2 = vld [vmem:[#allocation5 + $0x170] sm:$0xff]  ;;  %v2201_v4 = vld [vmem:[#allocation5 + $0x158] sm:$0xff]  ;;  %s2246_s29 = sshll.u32 %s2021_s24, 3  ;;  %v2944_v20 = vmov 0   ;;  %s1628_s16 = sshll.u32 %s2021_s24, 6 }
  0x39   : > { %v2197_v3 = vld [vmem:[#allocation5 + $0x150] sm:$0xff]  ;;  %409 = vmatpush.msra.mxu0 %v2193_v1  ;;  %429 = vmatpush.msra.mxu1 %v2195_v2  ;;  %v2203_v5 = vld [vmem:[#allocation5 + $0x138] sm:$0xff]  ;;  %v2205_v6 = vld [vmem:[#allocation5 + $0x140] sm:$0xff]  ;;  %v519_v24 = vstv %s2246_s29  ;;  %s640_s17 = sadd.s32 1, %s2246_s29  ;;  %s1255_s27 = sadd.s32 6, %s2246_s29 }
  0x3a   : > { %533 = vmatpush.msra.mxu3 %v2193_v1  ;;  %v2210_v7 = vld [vmem:[#allocation5 + $0x120] sm:$0xff]  ;;  %v2212_v8 = vld [vmem:[#allocation5 + $0x128] sm:$0xff]  ;;  %v2219_v10 = vld [vmem:[#allocation5 + $0x110] sm:$0xff]  ;;  %1717 = vset.pattern.permute.xlu0 %v2944_v20  ;;  %v641_v34 = vstv %s640_s17  ;;  %v1256_v48 = vstv %s1255_s27  ;;  %s763_s13 = sadd.s32 2, %s2246_s29  ;;  %s886_s14 = sadd.s32 3, %s2246_s29 }
  0x3b   : > { %410 = vmatpush.msra.mxu0 %v2197_v3  ;;  %430 = vmatpush.msra.mxu1 %v2201_v4  ;;  %v2217_v9 = vld [vmem:[#allocation5 + $0x108] sm:$0xff]  ;;  %v2224_v11 = vld [vmem:[#allocation5 + $0xf0] sm:$0xff]  ;;  %v2226_v12 = vld [vmem:[#allocation5 + $0xf8] sm:$0xff]  ;;  %s1378_s20 = sadd.s32 7, %s2246_s29  ;;  %s1009_s15 = sadd.s32 4, %s2246_s29 }
  0x3c   : > { %534 = vmatpush.msra.mxu3 %v2197_v3  ;;  %v2228_v13 = vld [vmem:[#allocation5 + $0x178] sm:$0xff]  ;;  %v2233_v14 = vld [vmem:[#allocation5 + $0x160] sm:$0xff]  ;;  %v2243_v17 = vld [vmem:[#allocation5 + $0x148] sm:$0xff]  ;;  %1718 = vset.pattern.permute.xlu1 %v2944_v20  ;;  %s1132_s3 = sadd.s32 5, %s2246_s29  ;;  %s1404_s10 = scalar_lea.hbm %s2937_s5, %s1628_s16 }
  0x3d   : > { %411 = vmatpush.msra.mxu0 %v2203_v5  ;;  %431 = vmatpush.msra.mxu1 %v2205_v6  ;;  %v2235_v15 = vld [vmem:[#allocation5 + $0xd8] sm:$0xff]  ;;  %v2237_v16 = vld [vmem:[#allocation5 + $0xe0] sm:$0xff]  ;;  %v2250_v19 = vld [vmem:[#allocation5 + $0xc8] sm:$0xff]  ;;  %s1407_s11 = sshll.u32 %s1404_s10, 4  ;;  %s2035_s24 = smov [#allocation8]   ;;  %s1408_s11 = int_to_ptr.hbm [resolvable:$true] %s1407_s11 }
  0x3e   : > { %535 = vmatpush.msra.mxu3 %v2203_v5  ;;  %449 = vmatpush.msra.mxu2 %v2228_v13  ;;  %v2248_v18 = vld [vmem:[#allocation5 + $0xc0] sm:$0xff]  ;;  %v2256_v21 = vld [vmem:[#allocation5 + $0x130] sm:$0xff]  ;;  %v2258_v22 = vld [vmem:[#allocation5 + $0xa8] sm:$0xff]  ;;  %s1925_s8 = sshra.s32 %s1408_s11, 4  ;;  %s1931_s16 = scalar_lea.hbm %s2937_s5, 128  ;;  %s1926_s8 = int_to_ptr.hbm [resolvable:$true] %s1925_s8 }
  0x3f   : > { %412 = vmatpush.msra.mxu0 %v2210_v7  ;;  %432 = vmatpush.msra.mxu1 %v2212_v8  ;;  %v2260_v23 = vld [vmem:[#allocation5 + $0xb0] sm:$0xff]  ;;  %v2267_v25 = vld [vmem:[#allocation5 + $0x118] sm:$0xff]  ;;  %v2277_v28 = vld [vmem:[%s2933_s1] sm:$0xff]  ;;  %s1927_s12 = scalar_lea.hbm %s1926_s8, 64  ;;  %p1932_p13 = scmp.lt.s32.totalorder %s1926_s8, %s2937_s5 }
  0x40   : > { %536 = vmatpush.msra.mxu3 %v2210_v7  ;;  %450 = vmatpush.msra.mxu2 %v2233_v14  ;;  %v2269_v26 = vld [vmem:[#allocation5 + $0x90] sm:$0xff]  ;;  %v2271_v27 = vld [vmem:[#allocation5 + $0x98] sm:$0xff]  ;;  %2981 = vst [vmem:[#allocation17_spill] sm:$0xff] %v2277_v28  ;;  %v2283_v29 = vld [vmem:[#allocation5 + $0x100] sm:$0xff]  ;;  %vm520_vm0 = vcmp.lt.s32.totalorder %v519_v24, %v2277_v28  ;;  %vm642_vm1 = vcmp.lt.s32.totalorder %v641_v34, %v2277_v28  ;;  %p1928_p1 = scmp.ne.s32.totalorder %s1926_s8, %s1927_s12  ;;  %p1933_p0 = scmp.lt.s32.totalorder %s1931_s16, %s1927_s12 }
  0x41   : > { %413 = vmatpush.msra.mxu0 %v2217_v9  ;;  %433 = vmatpush.msra.mxu1 %v2219_v10  ;;  %v2286_v30 = vld [vmem:[#allocation5 + $0x78] sm:$0xff]  ;;  %v2288_v31 = vld [vmem:[#allocation5 + $0x80] sm:$0xff]  ;;  %v521_v32 = vsel %vm520_vm0, 1, %v2944_v20  ;;  %v2295_v33 = vld [vmem:[#allocation5 + $0xe8] sm:$0xff]  ;;  %v643_v44 = vsel %vm642_vm1, 1, %v2944_v20  ;;  %vm1257_vm2 = vcmp.lt.s32.totalorder %v1256_v48, %v2277_v28 }
  0x42   : > { %537 = vmatpush.msra.mxu3 %v2217_v9  ;;  %451 = vmatpush.msra.mxu2 %v2243_v17  ;;  %v2297_v35 = vld [vmem:[#allocation5 + $0x60] sm:$0xff]  ;;  %v2299_v36 = vld [vmem:[#allocation5 + $0x68] sm:$0xff]  ;;  %v2304_v37 = vld [vmem:[#allocation5 + $0xd0] sm:$0xff]  ;;  %v1258_v54 = vsel %vm1257_vm2, 1, %v2944_v20  ;;  %p1929_p4 = pnand %p1928_p1, %p2151_p5  ;;  %p1934_p3 = por %p1933_p0, %p1932_p13 }
  0x43   : > { %414 = vmatpush.msra.mxu0 %v2224_v11  ;;  %434 = vmatpush.msra.mxu1 %v2226_v12  ;;  %v2306_v38 = vld [vmem:[#allocation5 + $0x48] sm:$0xff]  ;;  %v2308_v39 = vld [vmem:[#allocation5 + $0x50] sm:$0xff]  ;;  %v2315_v40 = vld [vmem:[#allocation5 + $0xb8] sm:$0xff] }
  0x44   : > { %538 = vmatpush.msra.mxu3 %v2224_v11  ;;  %452 = vmatpush.msra.mxu2 %v2256_v21  ;;  %2982 = vst [vmem:[#allocation18_spill] sm:$0xff] %v2308_v39  ;;  %v2317_v41 = vld [vmem:[#allocation5 + $0x30] sm:$0xff]  ;;  %v2319_v42 = vld [vmem:[#allocation5 + $0x38] sm:$0xff]  ;;  %v2326_v43 = vld [vmem:[#allocation5 + $0xa0] sm:$0xff]  ;;  %p1930_p12 = pneg %p1929_p4 }
  0x45   : > { %415 = vmatpush.msra.mxu0 %v2235_v15  ;;  %435 = vmatpush.msra.mxu1 %v2237_v16  ;;  %2983 = vst [vmem:[#allocation19_spill] sm:$0xff] %v2317_v41  ;;  %v2329_v45 = vld [vmem:[#allocation5 + $0x18] sm:$0xff]  ;;  %v2331_v46 = vld [vmem:[#allocation5 + $0x20] sm:$0xff]  ;;  %v2337_v47 = vld [vmem:[#allocation5 + $0x88] sm:$0xff] }
  0x46   : > { %539 = vmatpush.msra.mxu3 %v2235_v15  ;;  %453 = vmatpush.msra.mxu2 %v2267_v25  ;;  %2984 = vst [vmem:[#allocation20_spill] sm:$0xff] %v2319_v42  ;;  %v2339_v49 = vld [vmem:[#allocation5] sm:$0xff]  ;;  %v2341_v50 = vld [vmem:[#allocation5 + $0x8] sm:$0xff]  ;;  %v2349_v52 = vld [vmem:[#allocation5 + $0x70] sm:$0xff]  ;;  %p1935_p7 = pnand %p1934_p3, %p1930_p12 }
  0x47   : > { %416 = vmatpush.msra.mxu0 %v2248_v18  ;;  %436 = vmatpush.msra.mxu1 %v2250_v19  ;;  %2985 = vst [vmem:[#allocation21_spill] sm:$0xff] %v2329_v45  ;;  %v2346_v51 = vld [vmem:[#allocation8] sm:$0xff]  ;;  %v2357_v53 = vld [vmem:[#allocation5 + $0x58] sm:$0xff]  ;;  %v2368_v56 = vld [vmem:[#allocation5 + $0x28] sm:$0xff] }
  0x48   : > { %540 = vmatpush.msra.mxu3 %v2248_v18  ;;  %454 = vmatpush.msra.mxu2 %v2283_v29  ;;  %2986 = vst [vmem:[#allocation22_spill] sm:$0xff] %v2331_v46  ;;  %v2362_v55 = vld [vmem:[#allocation5 + $0x40] sm:$0xff]  ;;  %v2373_v57 = vld [vmem:[#allocation5 + $0x10] sm:$0xff]  ;;  %v407_v59 = vld [vmem:[%s2176_s28 + $0x8] sm:$0xff] }
  0x49   : > { %417 = vmatpush.msra.mxu0 %v2258_v22  ;;  %437 = vmatpush.msra.mxu1 %v2260_v23  ;;  %2987 = vst [vmem:[#allocation23_spill] sm:$0xff] %v2339_v49  ;;  %v406_v58 = vld [vmem:[%s2176_s28] sm:$0xff] }
  0x4a   : > { %523 = vperm.xlu0 %1717, %v521_v32   ;;  %455 = vmatpush.msra.mxu2 %v2295_v33  ;;  %2988 = vst [vmem:[#allocation24_spill] sm:$0xff] %v2341_v50 }
  0x4b   : > { %418 = vmatpush.msra.mxu0 %v2269_v26  ;;  %438 = vmatpush.msra.mxu1 %v2271_v27  ;;  %2989 = vst [vmem:[#allocation25_spill] sm:$0xff] %v2362_v55 }
  0x4c   : > { %541 = vmatpush.msra.mxu3 %v2258_v22  ;;  %456 = vmatpush.msra.mxu2 %v2304_v37  ;;  %2990 = vst [vmem:[#allocation26_spill] sm:$0xff] %v2368_v56 }
  0x4d   : > { %419 = vmatpush.msra.mxu0 %v2286_v30  ;;  %439 = vmatpush.msra.mxu1 %v2288_v31  ;;  %2991 = vst [vmem:[#allocation27_spill] sm:$0xff] %v2373_v57 }
  0x4e   : > { %542 = vmatpush.msra.mxu3 %v2269_v26  ;;  %457 = vmatpush.msra.mxu2 %v2315_v40 }
  0x4f   : > { %420 = vmatpush.msra.mxu0 %v2297_v35  ;;  %440 = vmatpush.msra.mxu1 %v2299_v36 }
  0x50   : > { %543 = vmatpush.msra.mxu3 %v2286_v30  ;;  %458 = vmatpush.msra.mxu2 %v2326_v43 }
  0x51   : > { %421 = vmatpush.msra.mxu0 %v2306_v38  ;;  %441 = vmatpush.msra.mxu1 %v2308_v39 }
  0x52   : > { %645 = vperm.xlu0 %1717, %v643_v44   ;;  %459 = vmatpush.msra.mxu2 %v2337_v47 }
  0x53   : > { %422 = vmatpush.msra.mxu0 %v2317_v41  ;;  %442 = vmatpush.msra.mxu1 %v2319_v42 }
  0x54   : > { %544 = vmatpush.msra.mxu3 %v2297_v35  ;;  %460 = vmatpush.msra.mxu2 %v2349_v52 }
  0x55   : > { %423 = vmatpush.msra.mxu0 %v2329_v45  ;;  %443 = vmatpush.msra.mxu1 %v2331_v46 }
  0x56   : > { %545 = vmatpush.msra.mxu3 %v2306_v38  ;;  %461 = vmatpush.msra.mxu2 %v2357_v53 }
  0x57   : > { %424 = vmatpush.msra.mxu0 %v2339_v49  ;;  %444 = vmatpush.msra.mxu1 %v2341_v50 }
  0x58   : > { %425 = vmatmul.f32.vlgmr.msra.gmra.mxu0 %v2346_v51  ;;  %445 = vmatmul.f32.vlgmr.msra.gmra.mxu1 %v2346_v51 }
  0x59   : > { %553 = vmatpush.msrb.mxu0 %v2195_v2  ;;  %573 = vmatpush.msrb.mxu1 %v2228_v13 }
  0x5a   : > { %1260 = vperm.xlu0 %1717, %v1258_v54   ;;  %462 = vmatpush.msra.mxu2 %v2362_v55 }
  0x5b   : > { %554 = vmatpush.msrb.mxu0 %v2201_v4  ;;  %574 = vmatpush.msrb.mxu1 %v2233_v14 }
  0x5c   : > { %546 = vmatpush.msra.mxu3 %v2317_v41  ;;  %463 = vmatpush.msra.mxu2 %v2368_v56 }
  0x5d   : > { %555 = vmatpush.msrb.mxu0 %v2205_v6  ;;  %575 = vmatpush.msrb.mxu1 %v2243_v17 }
  0x5e   : > { %547 = vmatpush.msra.mxu3 %v2329_v45  ;;  %464 = vmatpush.msra.mxu2 %v2373_v57 }
  0x5f   : > { %556 = vmatpush.msrb.mxu0 %v2212_v8  ;;  %576 = vmatpush.msrb.mxu1 %v2256_v21 }
  0x60   : > { %465 = vmatmul.f32.vlgmr.msra.gmra.mxu2 %v2346_v51  ;;  %548 = vmatpush.msra.mxu3 %v2339_v49 }
  0x61   : > { %557 = vmatpush.msrb.mxu0 %v2219_v10  ;;  %577 = vmatpush.msrb.mxu1 %v2267_v25 }
  0x62   : > { %656 = vmatpush.msrb.mxu2 %v2193_v1  ;;  %676 = vmatpush.msrb.mxu3 %v2195_v2 }
  0x63   : > { %558 = vmatpush.msrb.mxu0 %v2226_v12  ;;  %578 = vmatpush.msrb.mxu1 %v2283_v29 }
  0x64   : > { %657 = vmatpush.msrb.mxu2 %v2197_v3  ;;  %677 = vmatpush.msrb.mxu3 %v2201_v4 }
  0x65   : > { %559 = vmatpush.msrb.mxu0 %v2237_v16  ;;  %579 = vmatpush.msrb.mxu1 %v2295_v33 }
  0x66   : > { %658 = vmatpush.msrb.mxu2 %v2203_v5  ;;  %678 = vmatpush.msrb.mxu3 %v2205_v6 }
  0x67   : > { %560 = vmatpush.msrb.mxu0 %v2250_v19  ;;  %580 = vmatpush.msrb.mxu1 %v2304_v37 }
  0x68   : > { %659 = vmatpush.msrb.mxu2 %v2210_v7  ;;  %679 = vmatpush.msrb.mxu3 %v2212_v8 }
  0x69   : > { %561 = vmatpush.msrb.mxu0 %v2260_v23  ;;  %581 = vmatpush.msrb.mxu1 %v2315_v40 }
  0x6a   : > { %660 = vmatpush.msrb.mxu2 %v2217_v9  ;;  %680 = vmatpush.msrb.mxu3 %v2219_v10 }
  0x6b   : > { %562 = vmatpush.msrb.mxu0 %v2271_v27  ;;  %582 = vmatpush.msrb.mxu1 %v2326_v43 }
  0x6c   : > { %661 = vmatpush.msrb.mxu2 %v2224_v11  ;;  %681 = vmatpush.msrb.mxu3 %v2226_v12 }
  0x6d   : > { %563 = vmatpush.msrb.mxu0 %v2288_v31  ;;  %583 = vmatpush.msrb.mxu1 %v2337_v47 }
  0x6e   : > { %662 = vmatpush.msrb.mxu2 %v2235_v15  ;;  %682 = vmatpush.msrb.mxu3 %v2237_v16 }
  0x6f   : > { %564 = vmatpush.msrb.mxu0 %v2299_v36  ;;  %584 = vmatpush.msrb.mxu1 %v2349_v52 }
  0x70   : > { %663 = vmatpush.msrb.mxu2 %v2248_v18  ;;  %683 = vmatpush.msrb.mxu3 %v2250_v19 }
  0x71   : > { %565 = vmatpush.msrb.mxu0 %v2308_v39  ;;  %585 = vmatpush.msrb.mxu1 %v2357_v53 }
  0x72   : > { %664 = vmatpush.msrb.mxu2 %v2258_v22  ;;  %684 = vmatpush.msrb.mxu3 %v2260_v23 }
  0x73   : > { %566 = vmatpush.msrb.mxu0 %v2319_v42  ;;  %586 = vmatpush.msrb.mxu1 %v2362_v55 }
  0x74   : > { %665 = vmatpush.msrb.mxu2 %v2269_v26  ;;  %685 = vmatpush.msrb.mxu3 %v2271_v27 }
  0x75   : > { %567 = vmatpush.msrb.mxu0 %v2331_v46  ;;  %587 = vmatpush.msrb.mxu1 %v2368_v56 }
  0x76   : > { %666 = vmatpush.msrb.mxu2 %v2286_v30  ;;  %686 = vmatpush.msrb.mxu3 %v2288_v31 }
  0x77   : > { %568 = vmatpush.msrb.mxu0 %v2341_v50  ;;  %588 = vmatpush.msrb.mxu1 %v2373_v57 }
  0x78   : > { %667 = vmatpush.msrb.mxu2 %v2297_v35  ;;  %687 = vmatpush.msrb.mxu3 %v2299_v36 }
  0x79   : > { %696 = vmatpush.msra.mxu0 %v2228_v13  ;;  %779 = vmatpush.msra.mxu1 %v2193_v1 }
  0x7a   : > { %668 = vmatpush.msrb.mxu2 %v2306_v38  ;;  %688 = vmatpush.msrb.mxu3 %v2308_v39 }
  0x7b   : > { %697 = vmatpush.msra.mxu0 %v2233_v14  ;;  %780 = vmatpush.msra.mxu1 %v2197_v3 }
  0x7c   : > { %669 = vmatpush.msrb.mxu2 %v2317_v41  ;;  %689 = vmatpush.msrb.mxu3 %v2319_v42 }
  0x7d   : > { %698 = vmatpush.msra.mxu0 %v2243_v17  ;;  %781 = vmatpush.msra.mxu1 %v2203_v5 }
  0x7e   : > { %670 = vmatpush.msrb.mxu2 %v2329_v45  ;;  %690 = vmatpush.msrb.mxu3 %v2331_v46 }
  0x7f   : > { %699 = vmatpush.msra.mxu0 %v2256_v21  ;;  %782 = vmatpush.msra.mxu1 %v2210_v7 }
  0x80   : > { %671 = vmatpush.msrb.mxu2 %v2339_v49  ;;  %691 = vmatpush.msrb.mxu3 %v2341_v50 }
  0x81   : > { %700 = vmatpush.msra.mxu0 %v2267_v25  ;;  %783 = vmatpush.msra.mxu1 %v2217_v9 }
  0x82   : > { %799 = vmatpush.msra.mxu2 %v2195_v2  ;;  %1719 = vset.pattern.permute.xlu2 %v2944_v20 }
  0x83   : > { %701 = vmatpush.msra.mxu0 %v2283_v29  ;;  %784 = vmatpush.msra.mxu1 %v2224_v11 }
  0x84   : > { %800 = vmatpush.msra.mxu2 %v2201_v4 }
  0x85   : > { %702 = vmatpush.msra.mxu0 %v2295_v33  ;;  %785 = vmatpush.msra.mxu1 %v2235_v15 }
  0x86   : > { %801 = vmatpush.msra.mxu2 %v2205_v6 }
  0x87   : > { %703 = vmatpush.msra.mxu0 %v2304_v37  ;;  %786 = vmatpush.msra.mxu1 %v2248_v18 }
  0x88   : > { %802 = vmatpush.msra.mxu2 %v2212_v8 }
  0x89   : > { %704 = vmatpush.msra.mxu0 %v2315_v40  ;;  %787 = vmatpush.msra.mxu1 %v2258_v22 }
  0x8a   : > { %803 = vmatpush.msra.mxu2 %v2219_v10 }
  0x8b   : > { %705 = vmatpush.msra.mxu0 %v2326_v43  ;;  %788 = vmatpush.msra.mxu1 %v2269_v26 }
  0x8c   : > { %804 = vmatpush.msra.mxu2 %v2226_v12 }
  0x8d   : > { %706 = vmatpush.msra.mxu0 %v2337_v47  ;;  %789 = vmatpush.msra.mxu1 %v2286_v30 }
  0x8e   : > { %805 = vmatpush.msra.mxu2 %v2237_v16 }
  0x8f   : > { %707 = vmatpush.msra.mxu0 %v2349_v52  ;;  %790 = vmatpush.msra.mxu1 %v2297_v35 }
  0x90   : > { %806 = vmatpush.msra.mxu2 %v2250_v19 }
  0x91   : > { %708 = vmatpush.msra.mxu0 %v2357_v53  ;;  %791 = vmatpush.msra.mxu1 %v2306_v38 }
  0x92   : > { %807 = vmatpush.msra.mxu2 %v2260_v23 }
  0x93   : > { %709 = vmatpush.msra.mxu0 %v2362_v55  ;;  %792 = vmatpush.msra.mxu1 %v2317_v41 }
  0x94   : > { %808 = vmatpush.msra.mxu2 %v2271_v27 }
  0x95   : > { %710 = vmatpush.msra.mxu0 %v2368_v56  ;;  %793 = vmatpush.msra.mxu1 %v2329_v45 }
  0x96   : > { %809 = vmatpush.msra.mxu2 %v2288_v31 }
  0x97   : > { %711 = vmatpush.msra.mxu0 %v2373_v57  ;;  %794 = vmatpush.msra.mxu1 %v2339_v49  ;;  %v408_v49 = vld [vmem:[%s2176_s28 + $0x10] sm:$0xff] }
  0x98   : > { %810 = vmatpush.msra.mxu2 %v2299_v36 }
  0x9a   : > { %811 = vmatpush.msra.mxu2 %v2308_v39 }
  0x9c   : > { %812 = vmatpush.msra.mxu2 %v2319_v42 }
  0x9e   : > { %813 = vmatpush.msra.mxu2 %v2331_v46 }
  0xa0   : > { %814 = vmatpush.msra.mxu2 %v2341_v50 }
  0xd5   : > { %v426_v60 = vpop.f32.mrf.mxu0  ;;  %v446_v61 = vpop.f32.mrf.mxu1 }
  0xd6   : > { %v469_v62 = vadd.f32 %v426_v60, %v406_v58  ;;  %v489_v63 = vadd.f32 %v446_v61, %v407_v59  ;;  %v2495_v58 = vld [vmem:[%s2936_s4] ss:$0 sm:$0xff] }
  0xd8   : > { %v1577_v0 = vmul.f32 -1.442695, %v469_v62  ;;  %v1578_v24 = vmul.f32 -1.442695, %v489_v63 }
  0xda   : > { %1721 = vpow2.f32 %v1577_v0 }
  0xdb   : > { %1723 = vpow2.f32 %v1578_v24 }
  0xe0   : > { %v1722_v32 = vpop.eup %1721 }
  0xe1   : > { %v1724_v34 = vpop.eup %1723  ;;  %v473_v44 = vadd.f32 1.0, %v1722_v32 }
  0xe2   : > { %v493_v48 = vadd.f32 1.0, %v1724_v34 }
  0xe3   : > { %1725 = vrcp.f32 %v473_v44  ;;  %v466_v60 = vpop.f32.mrf.mxu2  ;;  %v485_v61 = vand.u32 2147483648, %v473_v44  ;;  %v483_v63 = vand.u32 2147483647, %v473_v44  ;;  %vm479_vm4 = vweird.f32 %v473_v44 }
  0xe4   : > { %1727 = vrcp.f32 %v493_v48  ;;  %v512_v24 = vadd.f32 %v2495_v58, %v466_v60  ;;  %vm499_vm7 = vweird.f32 %v493_v48 }
  0xe5   : > { %v486_v34 = vor.u32 1.1754944e-38, %v485_v61  ;;  %vm484_vm6 = vcmp.eq.f32.partialorder %v483_v63, 8.507059e+37  ;;  %v524_v63 = vpop.permute.xlu0 %523 }
  0xe6   : > { %vm525_vm11 = vcmp.eq.s32.totalorder %v524_v63, 1 }
  0xe9   : > { %v1726_v54 = vpop.eup %1725 }
  0xea   : > { %v1728_v20 = vpop.eup %1727  ;;  %v475_v28 = vmul.f32 %v1726_v54, %v473_v44  ;;  %vm480_vm3 = vweird.f32 %v1726_v54 }
  0xeb   : > { %v495_v59 = vmul.f32 %v1728_v20, %v493_v48  ;;  %vm481_vm5 = vmor %vm479_vm4, %vm480_vm3  ;;  %vm500_vm8 = vweird.f32 %v1728_v20 }
  0xec   : > { %v476_v50 = vsub.f32 1.0, %v475_v28  ;;  %vm501_vm9 = vmor %vm499_vm7, %vm500_vm8 }
  0xed   : > { %v496_v32 = vsub.f32 1.0, %v495_v59 }
  0xee   : > { %v477_v62 = vmul.f32 %v1726_v54, %v476_v50  ;;  %v505_v50 = vand.u32 2147483648, %v493_v48 }
  0xef   : > { %v497_v45 = vmul.f32 %v1728_v20, %v496_v32  ;;  %v1580_v32 = vld [vmem:[%s2176_s28 + $0x20] sm:$0xff] }
  0xf0   : > { %v478_v0 = vadd.f32 %v1726_v54, %v477_v62  ;;  %v503_v62 = vand.u32 2147483647, %v493_v48  ;;  %v506_v44 = vor.u32 1.1754944e-38, %v505_v50  ;;  %v2997_v48 = vld [vmem:[#allocation23_spill] sm:$0xff] }
  0xf1   : > { %v498_v42 = vadd.f32 %v1728_v20, %v497_v45  ;;  %v2994_v45 = vld [vmem:[#allocation21_spill] sm:$0xff] }
  0xf2   : > { %v482_v28 = vsel %vm481_vm5, %v1726_v54, %v478_v0  ;;  %vm504_vm10 = vcmp.eq.f32.partialorder %v503_v62, 8.507059e+37  ;;  %v1579_v62 = vld [vmem:[%s2176_s28 + $0x18] sm:$0xff] }
  0xf3   : > { %v487_v57 = vsel %vm484_vm6, %v486_v34, %v482_v28  ;;  %v502_v60 = vsel %vm501_vm9, %v1728_v20, %v498_v42  ;;  %v2992_v20 = vld [vmem:[#allocation20_spill] sm:$0xff]  ;;  %v2993_v42 = vld [vmem:[#allocation26_spill] sm:$0xff] }
  0xf4   : > { %v513_v46 = vmul.f32 %v512_v24, %v487_v57  ;;  %v507_v61 = vsel %vm504_vm10, %v506_v44, %v502_v60  ;;  %v2998_v24 = vld [vmem:[#allocation24_spill] sm:$0xff] }
  0xf6   : > { %v514_v56 = vadd.f32 %v513_v46, %v408_v49 }
  0xf8   : > { %1729 = vtanh.f32 %v514_v56  ;;  %v2996_v56 = vld [vmem:[#allocation27_spill] sm:$0xff] }
  0xfe   : > { %v1730_v59 = vpop.eup %1729 }
  0xff   : > { %v516_v54 = vsub.f32 %v2346_v51, %v1730_v59 }
 0x101   : > { %v517_v0 = vmul.f32 %v516_v54, %v507_v61 }
 0x103   : > { %v518_v57 = vadd.f32 %v1730_v59, %v517_v0 }
 0x105   : > { %v526_v46 = vsel %vm525_vm11, %v518_v57, 0.0  ;;  %v2501_v49 = vsel %vm525_vm11, %v518_v57, %v2346_v51  ;;  %v2995_v51 = vld [vmem:[#allocation22_spill] sm:$0xff]  ;;  %v764_v57 = vstv %s763_s13  ;;  %s2884_s13 = sshll.u32 %s2035_s24, 4  ;;  %s1423_s13 = int_to_ptr.vmem [resolvable:$true] %s2884_s13 }
 0x106   : > { %527 = vst [vmem:[%s2187_s21] sm:$0xff] %v526_v46  ;;  %549 = vmatmul.f32.vlgmr.msra.gmra.mxu3 %v2501_v49  ;;  %569 = vmatmul.f32.vlgmr.msrb.gmra.mxu0 %v2501_v49  ;;  %v2999_v46 = vld [vmem:[#allocation17_spill] sm:$0xff] }
 0x107   : > { %589 = vmatmul.f32.vlgmr.msrb.gmra.mxu1 %v2501_v49  ;;  %819 = vmatpush.msra.mxu3 %v2228_v13  ;;  %vm765_vm12 = vcmp.lt.s32.totalorder %v764_v57, %v2999_v46 }
 0x108   : > { %902 = vmatpush.msrb.mxu0 %v2193_v1  ;;  %922 = vmatpush.msrb.mxu1 %v2195_v2 }
 0x109   : > { %820 = vmatpush.msra.mxu3 %v2233_v14 }
 0x10a   : > { %903 = vmatpush.msrb.mxu0 %v2197_v3  ;;  %923 = vmatpush.msrb.mxu1 %v2201_v4 }
 0x10b   : > { %821 = vmatpush.msra.mxu3 %v2243_v17 }
 0x10c   : > { %904 = vmatpush.msrb.mxu0 %v2203_v5  ;;  %924 = vmatpush.msrb.mxu1 %v2205_v6 }
 0x10d   : > { %822 = vmatpush.msra.mxu3 %v2256_v21 }
 0x10e   : > { %905 = vmatpush.msrb.mxu0 %v2210_v7  ;;  %925 = vmatpush.msrb.mxu1 %v2212_v8 }
 0x10f   : > { %823 = vmatpush.msra.mxu3 %v2267_v25 }
 0x110   : > { %906 = vmatpush.msrb.mxu0 %v2217_v9  ;;  %926 = vmatpush.msrb.mxu1 %v2219_v10 }
 0x111   : > { %824 = vmatpush.msra.mxu3 %v2283_v29 }
 0x112   : > { %907 = vmatpush.msrb.mxu0 %v2224_v11  ;;  %927 = vmatpush.msrb.mxu1 %v2226_v12 }
 0x113   : > { %825 = vmatpush.msra.mxu3 %v2295_v33 }
 0x114   : > { %908 = vmatpush.msrb.mxu0 %v2235_v15  ;;  %928 = vmatpush.msrb.mxu1 %v2237_v16 }
 0x115   : > { %826 = vmatpush.msra.mxu3 %v2304_v37 }
 0x116   : > { %909 = vmatpush.msrb.mxu0 %v2248_v18  ;;  %929 = vmatpush.msrb.mxu1 %v2250_v19 }
 0x117   : > { %827 = vmatpush.msra.mxu3 %v2315_v40 }
 0x118   : > { %910 = vmatpush.msrb.mxu0 %v2258_v22  ;;  %930 = vmatpush.msrb.mxu1 %v2260_v23 }
 0x119   : > { %828 = vmatpush.msra.mxu3 %v2326_v43 }
 0x11a   : > { %911 = vmatpush.msrb.mxu0 %v2269_v26  ;;  %931 = vmatpush.msrb.mxu1 %v2271_v27 }
 0x11b   : > { %829 = vmatpush.msra.mxu3 %v2337_v47 }
 0x11c   : > { %912 = vmatpush.msrb.mxu0 %v2286_v30  ;;  %932 = vmatpush.msrb.mxu1 %v2288_v31 }
 0x11d   : > { %830 = vmatpush.msra.mxu3 %v2349_v52 }
 0x11e   : > { %913 = vmatpush.msrb.mxu0 %v2297_v35  ;;  %933 = vmatpush.msrb.mxu1 %v2299_v36 }
 0x11f   : > { %831 = vmatpush.msra.mxu3 %v2357_v53 }
 0x120   : > { %914 = vmatpush.msrb.mxu0 %v2306_v38  ;;  %934 = vmatpush.msrb.mxu1 %v2308_v39 }
 0x121   : > { %832 = vmatpush.msra.mxu3 %v2362_v55 }
 0x122   : > { %915 = vmatpush.msrb.mxu0 %v2317_v41  ;;  %935 = vmatpush.msrb.mxu1 %v2992_v20 }
 0x123   : > { %833 = vmatpush.msra.mxu3 %v2993_v42  ;;  %v1379_v42 = vstv %s1378_s20 }
 0x124   : > { %916 = vmatpush.msrb.mxu0 %v2994_v45  ;;  %936 = vmatpush.msrb.mxu1 %v2995_v51  ;;  %vm1380_vm2 = vcmp.lt.s32.totalorder %v1379_v42, %v2999_v46 }
 0x125   : > { %834 = vmatpush.msra.mxu3 %v2996_v56 }
 0x126   : > { %917 = vmatpush.msrb.mxu0 %v2997_v48  ;;  %937 = vmatpush.msrb.mxu1 %v2998_v24  ;;  %v887_v24 = vstv %s886_s14 }
 0x127   : > { %vm888_vm13 = vcmp.lt.s32.totalorder %v887_v24, %v2999_v46 }
 0x183   : > { %v570_v34 = vpop.f32.mrf.mxu0 }
 0x184   : > { %v613_v28 = vadd.f32 %v1580_v32, %v570_v34  ;;  %v3000_v34 = vmov 0   ;;  %v590_v48 = vpop.f32.mrf.mxu1 }
 0x185   : > { %v889_v57 = vsel %vm888_vm13, 1, %v3000_v34  ;;  %v1381_v39 = vsel %vm1380_vm2, 1, %v3000_v34 }
 0x186   : > { %v1583_v50 = vmul.f32 -1.442695, %v613_v28  ;;  %v766_v28 = vsel %vm765_vm12, 1, %v3000_v34 }
 0x187   : > { %768 = vperm.xlu1 %1718, %v766_v28   ;;  %v633_v28 = vadd.f32 %v2495_v58, %v590_v48 }
 0x188   : > { %1731 = vpow2.f32 %v1583_v50 }
 0x189   : > { %v550_v44 = vpop.f32.mrf.mxu3 }
 0x18a   : > { %v593_v60 = vadd.f32 %v1579_v62, %v550_v44 }
 0x18c   : > { %v1582_v59 = vmul.f32 -1.442695, %v593_v60 }
 0x18e   : > { %1733 = vpow2.f32 %v1582_v59  ;;  %v1732_v54 = vpop.eup %1731 }
 0x18f   : > { %v617_v63 = vadd.f32 1.0, %v1732_v54  ;;  %891 = vperm.xlu1 %1718, %v889_v57  }
 0x191   : > { %vm623_vm4 = vweird.f32 %v617_v63  ;;  %v627_v48 = vand.u32 2147483647, %v617_v63 }
 0x193   : > { %vm628_vm6 = vcmp.eq.f32.partialorder %v627_v48, 8.507059e+37 }
 0x194   : > { %v1734_v61 = vpop.eup %1733 }
 0x195   : > { %v597_v0 = vadd.f32 1.0, %v1734_v61 }
 0x197   : > { %1735 = vrcp.f32 %v597_v0  ;;  %v609_v59 = vand.u32 2147483648, %v597_v0  ;;  %v607_v61 = vand.u32 2147483647, %v597_v0  ;;  %vm603_vm15 = vweird.f32 %v597_v0  ;;  %1383 = vperm.xlu1 %1718, %v1381_v39  }
 0x198   : > { %1737 = vrcp.f32 %v617_v63 }
 0x199   : > { %v610_v45 = vor.u32 1.1754944e-38, %v609_v59  ;;  %vm608_vm1 = vcmp.eq.f32.partialorder %v607_v61, 8.507059e+37 }
 0x19d   : > { %v1736_v32 = vpop.eup %1735 }
 0x19e   : > { %v1738_v62 = vpop.eup %1737  ;;  %v599_v50 = vmul.f32 %v1736_v32, %v597_v0  ;;  %vm604_vm14 = vweird.f32 %v1736_v32 }
 0x19f   : > { %v619_v60 = vmul.f32 %v1738_v62, %v617_v63  ;;  %vm605_vm0 = vmor %vm603_vm15, %vm604_vm14  ;;  %vm624_vm3 = vweird.f32 %v1738_v62 }
 0x1a0   : > { %v600_v44 = vsub.f32 1.0, %v599_v50  ;;  %vm625_vm5 = vmor %vm623_vm4, %vm624_vm3 }
 0x1a1   : > { %v620_v51 = vsub.f32 1.0, %v619_v60  ;;  %v629_v60 = vand.u32 2147483648, %v617_v63 }
 0x1a2   : > { %v601_v54 = vmul.f32 %v1736_v32, %v600_v44  ;;  %v1581_v44 = vld [vmem:[%s2176_s28 + $0x28] sm:$0xff] }
 0x1a3   : > { %v621_v41 = vmul.f32 %v1738_v62, %v620_v51 }
 0x1a4   : > { %v602_v56 = vadd.f32 %v1736_v32, %v601_v54 }
 0x1a5   : > { %v622_v0 = vadd.f32 %v1738_v62, %v621_v41 }
 0x1a6   : > { %v606_v50 = vsel %vm605_vm0, %v1736_v32, %v602_v56 }
 0x1a7   : > { %v611_v24 = vsel %vm608_vm1, %v610_v45, %v606_v50  ;;  %v626_v56 = vsel %vm625_vm5, %v1738_v62, %v622_v0  ;;  %v630_v45 = vor.u32 1.1754944e-38, %v629_v60 }
 0x1a8   : > { %v634_v20 = vmul.f32 %v633_v28, %v611_v24 }
 0x1a9   : > { %v631_v42 = vsel %vm628_vm6, %v630_v45, %v626_v56 }
 0x1aa   : > { %v635_v55 = vadd.f32 %v1581_v44, %v634_v20  ;;  %v646_v20 = vpop.permute.xlu0 %645  ;;  %v1587_v44 = vld [vmem:[%s2176_s28 + $0x40] sm:$0xff] }
 0x1ab   : > { %vm647_vm7 = vcmp.eq.s32.totalorder %v646_v20, 1 }
 0x1ac   : > { %1739 = vtanh.f32 %v635_v55 }
 0x1b2   : > { %v1740_v32 = vpop.eup %1739 }
 0x1b3   : > { %v637_v59 = vsub.f32 %v2501_v49, %v1740_v32 }
 0x1b5   : > { %v638_v51 = vmul.f32 %v637_v59, %v631_v42 }
 0x1b7   : > { %v639_v46 = vadd.f32 %v1740_v32, %v638_v51 }
 0x1b9   : > { %v648_v55 = vsel %vm647_vm7, %v639_v46, 0.0  ;;  %v2570_v41 = vsel %vm647_vm7, %v639_v46, %v2501_v49 }
 0x1ba   : > { %1584 = vst [vmem:[%s2187_s21 + $0x8] sm:$0xff] %v648_v55  ;;  %672 = vmatmul.f32.vlgmr.msrb.gmra.mxu2 %v2570_v41  ;;  %692 = vmatmul.f32.vlgmr.msrb.gmra.mxu3 %v2570_v41 }
 0x1bb   : > { %712 = vmatmul.f32.vlgmr.msra.gmra.mxu0 %v2570_v41  ;;  %942 = vmatpush.msrb.mxu2 %v2228_v13 }
 0x1bc   : > { %1025 = vmatpush.msrb.mxu3 %v2193_v1  ;;  %1045 = vmatpush.msra.mxu0 %v2195_v2  ;;  %v3001_v1 = vld [vmem:[#allocation18_spill] sm:$0xff]  ;;  %v3002_v2 = vld [vmem:[#allocation25_spill] sm:$0xff] }
 0x1bd   : > { %943 = vmatpush.msrb.mxu2 %v2233_v14 }
 0x1be   : > { %1026 = vmatpush.msrb.mxu3 %v2197_v3  ;;  %1046 = vmatpush.msra.mxu0 %v2201_v4  ;;  %v3003_v3 = vld [vmem:[#allocation19_spill] sm:$0xff]  ;;  %v3004_v4 = vld [vmem:[#allocation20_spill] sm:$0xff] }
 0x1bf   : > { %944 = vmatpush.msrb.mxu2 %v2243_v17 }
 0x1c0   : > { %1027 = vmatpush.msrb.mxu3 %v2203_v5  ;;  %1047 = vmatpush.msra.mxu0 %v2205_v6  ;;  %v3005_v5 = vld [vmem:[#allocation26_spill] sm:$0xff]  ;;  %v3006_v6 = vld [vmem:[#allocation21_spill] sm:$0xff] }
 0x1c1   : > { %945 = vmatpush.msrb.mxu2 %v2256_v21 }
 0x1c2   : > { %1028 = vmatpush.msrb.mxu3 %v2210_v7  ;;  %1048 = vmatpush.msra.mxu0 %v2212_v8  ;;  %v3007_v7 = vld [vmem:[#allocation22_spill] sm:$0xff]  ;;  %v3008_v8 = vld [vmem:[#allocation27_spill] sm:$0xff] }
 0x1c3   : > { %946 = vmatpush.msrb.mxu2 %v2267_v25 }
 0x1c4   : > { %1029 = vmatpush.msrb.mxu3 %v2217_v9  ;;  %1049 = vmatpush.msra.mxu0 %v2219_v10  ;;  %v3009_v9 = vld [vmem:[#allocation23_spill] sm:$0xff]  ;;  %v3010_v10 = vld [vmem:[#allocation24_spill] sm:$0xff] }
 0x1c5   : > { %947 = vmatpush.msrb.mxu2 %v2283_v29 }
 0x1c6   : > { %1030 = vmatpush.msrb.mxu3 %v2224_v11  ;;  %1050 = vmatpush.msra.mxu0 %v2226_v12  ;;  %v1585_v11 = vld [vmem:[%s2176_s28 + $0x30] sm:$0xff]  ;;  %v1586_v12 = vld [vmem:[%s2176_s28 + $0x38] sm:$0xff] }
 0x1c7   : > { %948 = vmatpush.msrb.mxu2 %v2295_v33 }
 0x1c8   : > { %1031 = vmatpush.msrb.mxu3 %v2235_v15  ;;  %1051 = vmatpush.msra.mxu0 %v2237_v16 }
 0x1c9   : > { %949 = vmatpush.msrb.mxu2 %v2304_v37 }
 0x1ca   : > { %1032 = vmatpush.msrb.mxu3 %v2248_v18  ;;  %1052 = vmatpush.msra.mxu0 %v2250_v19 }
 0x1cb   : > { %950 = vmatpush.msrb.mxu2 %v2315_v40 }
 0x1cc   : > { %1033 = vmatpush.msrb.mxu3 %v2258_v22  ;;  %1053 = vmatpush.msra.mxu0 %v2260_v23 }
 0x1cd   : > { %951 = vmatpush.msrb.mxu2 %v2326_v43 }
 0x1ce   : > { %1034 = vmatpush.msrb.mxu3 %v2269_v26  ;;  %1054 = vmatpush.msra.mxu0 %v2271_v27 }
 0x1cf   : > { %952 = vmatpush.msrb.mxu2 %v2337_v47 }
 0x1d0   : > { %1035 = vmatpush.msrb.mxu3 %v2286_v30  ;;  %1055 = vmatpush.msra.mxu0 %v2288_v31 }
 0x1d1   : > { %953 = vmatpush.msrb.mxu2 %v2349_v52 }
 0x1d2   : > { %1036 = vmatpush.msrb.mxu3 %v2297_v35  ;;  %1056 = vmatpush.msra.mxu0 %v2299_v36 }
 0x1d3   : > { %954 = vmatpush.msrb.mxu2 %v2357_v53 }
 0x1d4   : > { %1037 = vmatpush.msrb.mxu3 %v2306_v38  ;;  %1057 = vmatpush.msra.mxu0 %v3001_v1 }
 0x1d5   : > { %955 = vmatpush.msrb.mxu2 %v3002_v2 }
 0x1d6   : > { %1038 = vmatpush.msrb.mxu3 %v3003_v3  ;;  %1058 = vmatpush.msra.mxu0 %v3004_v4 }
 0x1d7   : > { %956 = vmatpush.msrb.mxu2 %v3005_v5 }
 0x1d8   : > { %1039 = vmatpush.msrb.mxu3 %v3006_v6  ;;  %1059 = vmatpush.msra.mxu0 %v3007_v7 }
 0x1d9   : > { %957 = vmatpush.msrb.mxu2 %v3008_v8 }
 0x1da   : > { %1040 = vmatpush.msrb.mxu3 %v3009_v9  ;;  %1060 = vmatpush.msra.mxu0 %v3010_v10 }
 0x238   : > { %v713_v54 = vpop.f32.mrf.mxu0 }
 0x239   : > { %v756_v50 = vadd.f32 %v2495_v58, %v713_v54  ;;  %v2690_v54 = vld [vmem:[#allocation5 + $0xe0] sm:$0xff] }
 0x23d   : > { %v673_v13 = vpop.f32.mrf.mxu2  ;;  %v693_v14 = vpop.f32.mrf.mxu3 }
 0x23e   : > { %v716_v15 = vadd.f32 %v1585_v11, %v673_v13  ;;  %v736_v16 = vadd.f32 %v1586_v12, %v693_v14  ;;  %v769_v11 = vpop.permute.xlu1 %768 }
 0x23f   : > { %vm770_vm0 = vcmp.eq.s32.totalorder %v769_v11, 1  ;;  %v1593_v11 = vld [vmem:[%s2176_s28 + $0x58] sm:$0xff] }
 0x240   : > { %v1588_v17 = vmul.f32 -1.442695, %v716_v15  ;;  %v1589_v18 = vmul.f32 -1.442695, %v736_v16  ;;  %v2636_v16 = vld [vmem:[#allocation5 + $0x178] sm:$0xff] }
 0x242   : > { %1741 = vpow2.f32 %v1588_v17  ;;  %v2639_v17 = vld [vmem:[#allocation5 + $0x168] sm:$0xff] }
 0x243   : > { %1743 = vpow2.f32 %v1589_v18  ;;  %v2642_v18 = vld [vmem:[#allocation5 + $0x170] sm:$0xff] }
 0x248   : > { %v1742_v19 = vpop.eup %1741 }
 0x249   : > { %v1744_v21 = vpop.eup %1743  ;;  %v720_v22 = vadd.f32 1.0, %v1742_v19  ;;  %v2648_v19 = vld [vmem:[#allocation5 + $0x150] sm:$0xff] }
 0x24a   : > { %v740_v23 = vadd.f32 1.0, %v1744_v21  ;;  %v2651_v21 = vld [vmem:[#allocation5 + $0x158] sm:$0xff] }
 0x24b   : > { %1745 = vrcp.f32 %v720_v22  ;;  %v732_v39 = vand.u32 2147483648, %v720_v22  ;;  %v730_v62 = vand.u32 2147483647, %v720_v22  ;;  %vm726_vm9 = vweird.f32 %v720_v22 }
 0x24c   : > { %1747 = vrcp.f32 %v740_v23  ;;  %v752_v45 = vand.u32 2147483648, %v740_v23  ;;  %vm746_vm13 = vweird.f32 %v740_v23  ;;  %v750_v59 = vand.u32 2147483647, %v740_v23 }
 0x24d   : > { %v733_v57 = vor.u32 1.1754944e-38, %v732_v39  ;;  %vm731_vm11 = vcmp.eq.f32.partialorder %v730_v62, 8.507059e+37  ;;  %v2673_v39 = vld [vmem:[#allocation5 + $0x108] sm:$0xff]  ;;  %v2683_v62 = vld [vmem:[#allocation5 + $0xf8] sm:$0xff] }
 0x24e   : > { %v753_v20 = vor.u32 1.1754944e-38, %v752_v45  ;;  %vm751_vm15 = vcmp.eq.f32.partialorder %v750_v59, 8.507059e+37 }
 0x251   : > { %v1746_v26 = vpop.eup %1745 }
 0x252   : > { %v1748_v27 = vpop.eup %1747  ;;  %v722_v30 = vmul.f32 %v1746_v26, %v720_v22  ;;  %vm727_vm8 = vweird.f32 %v1746_v26  ;;  %v2654_v22 = vld [vmem:[#allocation5 + $0x148] sm:$0xff] }
 0x253   : > { %v742_v49 = vmul.f32 %v1748_v27, %v740_v23  ;;  %vm728_vm10 = vmor %vm726_vm9, %vm727_vm8  ;;  %vm747_vm12 = vweird.f32 %v1748_v27  ;;  %v2657_v23 = vld [vmem:[#allocation5 + $0x138] sm:$0xff] }
 0x254   : > { %v723_v31 = vsub.f32 1.0, %v722_v30  ;;  %vm748_vm14 = vmor %vm746_vm13, %vm747_vm12  ;;  %v2666_v30 = vld [vmem:[#allocation5 + $0x120] sm:$0xff] }
 0x255   : > { %v743_v28 = vsub.f32 1.0, %v742_v49  ;;  %v2676_v49 = vld [vmem:[#allocation5 + $0x110] sm:$0xff] }
 0x256   : > { %v724_v63 = vmul.f32 %v1746_v26, %v723_v31  ;;  %v2669_v31 = vld [vmem:[#allocation5 + $0x128] sm:$0xff] }
 0x257   : > { %v744_v48 = vmul.f32 %v1748_v27, %v743_v28  ;;  %v2711_v28 = vld [vmem:[#allocation5 + $0x98] sm:$0xff] }
 0x258   : > { %v725_v61 = vadd.f32 %v1746_v26, %v724_v63  ;;  %v2680_v63 = vld [vmem:[#allocation5 + $0xf0] sm:$0xff] }
 0x259   : > { %v745_v32 = vadd.f32 %v1748_v27, %v744_v48 }
 0x25a   : > { %v729_v24 = vsel %vm728_vm10, %v1746_v26, %v725_v61  ;;  %v2660_v26 = vld [vmem:[#allocation5 + $0x140] sm:$0xff]  ;;  %v2697_v61 = vld [vmem:[#allocation5 + $0xc8] sm:$0xff] }
 0x25b   : > { %v734_v0 = vsel %vm731_vm11, %v733_v57, %v729_v24  ;;  %v749_v42 = vsel %vm748_vm14, %v1748_v27, %v745_v32  ;;  %v2663_v27 = vld [vmem:[#allocation5 + $0x130] sm:$0xff]  ;;  %v1133_v24 = vstv %s1132_s3  ;;  %s1392_s3 = scalar_lea.sflag [#allocation4], %s2172_s18 }
 0x25c   : > { %v757_v60 = vmul.f32 %v756_v50, %v734_v0  ;;  %v754_v55 = vsel %vm751_vm15, %v753_v20, %v749_v42  ;;  %v2704_v57 = vld [vmem:[#allocation5 + $0xb0] sm:$0xff]  ;;  %v2718_v50 = vld [vmem:[#allocation5 + $0x80] sm:$0xff] }
 0x25e   : > { %v758_v56 = vadd.f32 %v1587_v44, %v757_v60 }
 0x260   : > { %1749 = vtanh.f32 %v758_v56 }
 0x266   : > { %v1750_v51 = vpop.eup %1749 }
 0x267   : > { %v760_v46 = vsub.f32 %v2570_v41, %v1750_v51 }
 0x269   : > { %v761_v12 = vmul.f32 %v760_v46, %v754_v55 }
 0x26b   : > { %v762_v13 = vadd.f32 %v1750_v51, %v761_v12 }
 0x26d   : > { %v771_v14 = vsel %vm770_vm0, %v762_v13, 0.0  ;;  %v2630_v15 = vsel %vm770_vm0, %v762_v13, %v2570_v41  ;;  %v2645_v41 = vld [vmem:[#allocation5 + $0x160] sm:$0xff] }
 0x26e   : > { %1590 = vst [vmem:[%s2187_s21 + $0x10] sm:$0xff] %v771_v14  ;;  %795 = vmatmul.f32.vlgmr.msra.gmra.mxu1 %v2630_v15  ;;  %815 = vmatmul.f32.vlgmr.msra.gmra.mxu2 %v2630_v15 }
 0x26f   : > { %835 = vmatmul.f32.vlgmr.msra.gmra.mxu3 %v2630_v15  ;;  %1065 = vmatpush.msra.mxu1 %v2636_v16 }
 0x270   : > { %1148 = vmatpush.msra.mxu2 %v2639_v17  ;;  %1168 = vmatpush.msra.mxu3 %v2642_v18 }
 0x271   : > { %1066 = vmatpush.msra.mxu1 %v2645_v41 }
 0x272   : > { %1149 = vmatpush.msra.mxu2 %v2648_v19  ;;  %1169 = vmatpush.msra.mxu3 %v2651_v21 }
 0x273   : > { %1067 = vmatpush.msra.mxu1 %v2654_v22 }
 0x274   : > { %1150 = vmatpush.msra.mxu2 %v2657_v23  ;;  %1170 = vmatpush.msra.mxu3 %v2660_v26 }
 0x275   : > { %1068 = vmatpush.msra.mxu1 %v2663_v27 }
 0x276   : > { %1151 = vmatpush.msra.mxu2 %v2666_v30  ;;  %1171 = vmatpush.msra.mxu3 %v2669_v31 }
 0x277   : > { %1069 = vmatpush.msra.mxu1 %v2267_v25  ;;  %v2687_v25 = vld [vmem:[#allocation5 + $0xd8] sm:$0xff] }
 0x278   : > { %1152 = vmatpush.msra.mxu2 %v2673_v39  ;;  %1172 = vmatpush.msra.mxu3 %v2676_v49 }
 0x279   : > { %1070 = vmatpush.msra.mxu1 %v2283_v29  ;;  %v2694_v29 = vld [vmem:[#allocation5 + $0xc0] sm:$0xff] }
 0x27a   : > { %1153 = vmatpush.msra.mxu2 %v2680_v63  ;;  %1173 = vmatpush.msra.mxu3 %v2683_v62 }
 0x27b   : > { %1071 = vmatpush.msra.mxu1 %v2295_v33  ;;  %v2701_v33 = vld [vmem:[#allocation5 + $0xa8] sm:$0xff] }
 0x27c   : > { %1154 = vmatpush.msra.mxu2 %v2687_v25  ;;  %1174 = vmatpush.msra.mxu3 %v2690_v54 }
 0x27d   : > { %1072 = vmatpush.msra.mxu1 %v2304_v37  ;;  %v2708_v37 = vld [vmem:[#allocation5 + $0x90] sm:$0xff] }
 0x27e   : > { %1155 = vmatpush.msra.mxu2 %v2694_v29  ;;  %1175 = vmatpush.msra.mxu3 %v2697_v61 }
 0x27f   : > { %1073 = vmatpush.msra.mxu1 %v2315_v40  ;;  %v2715_v40 = vld [vmem:[#allocation5 + $0x78] sm:$0xff] }
 0x280   : > { %1156 = vmatpush.msra.mxu2 %v2701_v33  ;;  %1176 = vmatpush.msra.mxu3 %v2704_v57 }
 0x281   : > { %1074 = vmatpush.msra.mxu1 %v2326_v43 }
 0x282   : > { %1157 = vmatpush.msra.mxu2 %v2708_v37  ;;  %1177 = vmatpush.msra.mxu3 %v2711_v28 }
 0x283   : > { %1075 = vmatpush.msra.mxu1 %v2337_v47  ;;  %v1592_v47 = vld [vmem:[%s2176_s28 + $0x50] sm:$0xff] }
 0x284   : > { %1158 = vmatpush.msra.mxu2 %v2715_v40  ;;  %1178 = vmatpush.msra.mxu3 %v2718_v50 }
 0x285   : > { %1076 = vmatpush.msra.mxu1 %v2349_v52 }
 0x286   : > { %1159 = vmatpush.msra.mxu2 %v2297_v35  ;;  %1179 = vmatpush.msra.mxu3 %v2299_v36  ;;  %v1591_v35 = vld [vmem:[%s2176_s28 + $0x48] sm:$0xff] }
 0x287   : > { %1077 = vmatpush.msra.mxu1 %v2357_v53 }
 0x288   : > { %1160 = vmatpush.msra.mxu2 %v2306_v38  ;;  %1180 = vmatpush.msra.mxu3 %v3001_v1 }
 0x289   : > { %1078 = vmatpush.msra.mxu1 %v3002_v2 }
 0x28a   : > { %1161 = vmatpush.msra.mxu2 %v3003_v3  ;;  %1181 = vmatpush.msra.mxu3 %v3004_v4 }
 0x28b   : > { %1079 = vmatpush.msra.mxu1 %v3005_v5 }
 0x28c   : > { %1162 = vmatpush.msra.mxu2 %v3006_v6  ;;  %1182 = vmatpush.msra.mxu3 %v3007_v7  ;;  %v1010_v6 = vstv %s1009_s15  ;;  %v1827_v7 = vld [vmem:[%s2933_s1] sm:$0xff]  ;;  %s1424_s15 = sshll.u32 %s2938_s6, 4  ;;  %s1425_s15 = int_to_ptr.hbm [resolvable:$true] %s1424_s15 }
 0x28d   : > { %1080 = vmatpush.msra.mxu1 %v3008_v8  ;;  %vm1011_vm1 = vcmp.lt.s32.totalorder %v1010_v6, %v1827_v7  ;;  %vm1134_vm2 = vcmp.lt.s32.totalorder %v1133_v24, %v1827_v7 }
 0x28e   : > { %1163 = vmatpush.msra.mxu2 %v3009_v9  ;;  %1183 = vmatpush.msra.mxu3 %v3010_v10  ;;  %v1012_v10 = vsel %vm1011_vm1, 1, %v3000_v34  ;;  %v1135_v42 = vsel %vm1134_vm2, 1, %v3000_v34 }
 0x28f   : > { %1014 = vperm.xlu2 %1719, %v1012_v10  }
 0x297   : > { %1137 = vperm.xlu2 %1719, %v1135_v42  }
 0x2eb   : > { %v796_v36 = vpop.f32.mrf.mxu1 }
 0x2ec   : > { %v839_v38 = vadd.f32 %v1591_v35, %v796_v36 }
 0x2ee   : > { %v1594_v43 = vmul.f32 -1.442695, %v839_v38 }
 0x2f0   : > { %1751 = vpow2.f32 %v1594_v43 }
 0x2f1   : > { %v816_v52 = vpop.f32.mrf.mxu2 }
 0x2f2   : > { %v859_v53 = vadd.f32 %v1592_v47, %v816_v52  ;;  %v836_v32 = vpop.f32.mrf.mxu3 }
 0x2f3   : > { %v879_v55 = vadd.f32 %v2495_v58, %v836_v32 }
 0x2f4   : > { %v1595_v1 = vmul.f32 -1.442695, %v859_v53 }
 0x2f6   : > { %v1752_v2 = vpop.eup %1751  ;;  %1753 = vpow2.f32 %v1595_v1 }
 0x2f7   : > { %v843_v3 = vadd.f32 1.0, %v1752_v2 }
 0x2f9   : > { %1755 = vrcp.f32 %v843_v3  ;;  %v855_v0 = vand.u32 2147483648, %v843_v3  ;;  %v853_v48 = vand.u32 2147483647, %v843_v3  ;;  %vm849_vm4 = vweird.f32 %v843_v3 }
 0x2fb   : > { %v856_v51 = vor.u32 1.1754944e-38, %v855_v0  ;;  %vm854_vm6 = vcmp.eq.f32.partialorder %v853_v48, 8.507059e+37 }
 0x2fc   : > { %v1754_v4 = vpop.eup %1753 }
 0x2fd   : > { %v863_v5 = vadd.f32 1.0, %v1754_v4 }
 0x2ff   : > { %v1756_v8 = vpop.eup %1755  ;;  %1757 = vrcp.f32 %v863_v5  ;;  %v875_v38 = vand.u32 2147483648, %v863_v5  ;;  %vm869_vm8 = vweird.f32 %v863_v5  ;;  %v873_v34 = vand.u32 2147483647, %v863_v5 }
 0x300   : > { %v845_v9 = vmul.f32 %v1756_v8, %v843_v3  ;;  %vm850_vm3 = vweird.f32 %v1756_v8  ;;  %v892_v3 = vpop.permute.xlu1 %891 }
 0x301   : > { %vm851_vm5 = vmor %vm849_vm4, %vm850_vm3  ;;  %v876_v52 = vor.u32 1.1754944e-38, %v875_v38  ;;  %vm874_vm10 = vcmp.eq.f32.partialorder %v873_v34, 8.507059e+37  ;;  %vm893_vm11 = vcmp.eq.s32.totalorder %v892_v3, 1  ;;  %v1599_v34 = vld [vmem:[%s2176_s28 + $0x70] sm:$0xff] }
 0x302   : > { %v846_v44 = vsub.f32 1.0, %v845_v9 }
 0x304   : > { %v847_v60 = vmul.f32 %v1756_v8, %v846_v44 }
 0x305   : > { %v1758_v56 = vpop.eup %1757 }
 0x306   : > { %v865_v45 = vmul.f32 %v1758_v56, %v863_v5  ;;  %v848_v59 = vadd.f32 %v1756_v8, %v847_v60  ;;  %vm870_vm7 = vweird.f32 %v1758_v56  ;;  %v1598_v5 = vld [vmem:[%s2176_s28 + $0x68] sm:$0xff] }
 0x307   : > { %vm871_vm9 = vmor %vm869_vm8, %vm870_vm7 }
 0x308   : > { %v866_v20 = vsub.f32 1.0, %v865_v45  ;;  %v852_v46 = vsel %vm851_vm5, %v1756_v8, %v848_v59 }
 0x309   : > { %v857_v12 = vsel %vm854_vm6, %v856_v51, %v852_v46 }
 0x30a   : > { %v880_v13 = vmul.f32 %v879_v55, %v857_v12  ;;  %v867_v14 = vmul.f32 %v1758_v56, %v866_v20 }
 0x30c   : > { %v881_v35 = vadd.f32 %v1593_v11, %v880_v13  ;;  %v868_v36 = vadd.f32 %v1758_v56, %v867_v14 }
 0x30e   : > { %1759 = vtanh.f32 %v881_v35  ;;  %v872_v43 = vsel %vm871_vm9, %v1758_v56, %v868_v36 }
 0x30f   : > { %v877_v1 = vsel %vm874_vm10, %v876_v52, %v872_v43 }
 0x314   : > { %v1760_v47 = vpop.eup %1759 }
 0x315   : > { %v883_v53 = vsub.f32 %v2630_v15, %v1760_v47 }
 0x317   : > { %v884_v2 = vmul.f32 %v883_v53, %v877_v1 }
 0x319   : > { %v885_v4 = vadd.f32 %v1760_v47, %v884_v2 }
 0x31b   : > { %v894_v6 = vsel %vm893_vm11, %v885_v4, 0.0  ;;  %v2749_v7 = vsel %vm893_vm11, %v885_v4, %v2630_v15  ;;  %v2767_v15 = vld [vmem:[#allocation5 + $0x118] sm:$0xff] }
 0x31c   : > { %1596 = vst [vmem:[%s2187_s21 + $0x18] sm:$0xff] %v894_v6  ;;  %918 = vmatmul.f32.vlgmr.msrb.gmra.mxu0 %v2749_v7  ;;  %938 = vmatmul.f32.vlgmr.msrb.gmra.mxu1 %v2749_v7 }
 0x31d   : > { %958 = vmatmul.f32.vlgmr.msrb.gmra.mxu2 %v2749_v7  ;;  %1188 = vmatpush.msrb.mxu0 %v2636_v16 }
 0x31e   : > { %1271 = vmatpush.msrb.mxu1 %v2639_v17  ;;  %1291 = vmatpush.msrb.mxu2 %v2642_v18  ;;  %v2772_v17 = vld [vmem:[#allocation5 + $0x100] sm:$0xff]  ;;  %v2777_v18 = vld [vmem:[#allocation5 + $0xe8] sm:$0xff] }
 0x31f   : > { %1189 = vmatpush.msrb.mxu0 %v2645_v41 }
 0x320   : > { %1272 = vmatpush.msrb.mxu1 %v2648_v19  ;;  %1292 = vmatpush.msrb.mxu2 %v2651_v21  ;;  %v2782_v19 = vld [vmem:[#allocation5 + $0xd0] sm:$0xff]  ;;  %v2787_v21 = vld [vmem:[#allocation5 + $0xb8] sm:$0xff] }
 0x321   : > { %1190 = vmatpush.msrb.mxu0 %v2654_v22 }
 0x322   : > { %1273 = vmatpush.msrb.mxu1 %v2657_v23  ;;  %1293 = vmatpush.msrb.mxu2 %v2660_v26  ;;  %v2792_v23 = vld [vmem:[#allocation5 + $0xa0] sm:$0xff]  ;;  %v2797_v26 = vld [vmem:[#allocation5 + $0x88] sm:$0xff] }
 0x323   : > { %1191 = vmatpush.msrb.mxu0 %v2663_v27 }
 0x324   : > { %1274 = vmatpush.msrb.mxu1 %v2666_v30  ;;  %1294 = vmatpush.msrb.mxu2 %v2669_v31  ;;  %v2802_v30 = vld [vmem:[#allocation5 + $0x70] sm:$0xff]  ;;  %v1836_v31 = vld [vmem:[#allocation5 + $0x60] sm:$0xff] }
 0x325   : > { %1192 = vmatpush.msrb.mxu0 %v2767_v15 }
 0x326   : > { %1275 = vmatpush.msrb.mxu1 %v2673_v39  ;;  %1295 = vmatpush.msrb.mxu2 %v2676_v49  ;;  %v1837_v39 = vld [vmem:[#allocation5 + $0x68] sm:$0xff]  ;;  %v2805_v49 = vld [vmem:[#allocation5 + $0x58] sm:$0xff] }
 0x327   : > { %1193 = vmatpush.msrb.mxu0 %v2772_v17 }
 0x328   : > { %1276 = vmatpush.msrb.mxu1 %v2680_v63  ;;  %1296 = vmatpush.msrb.mxu2 %v2683_v62  ;;  %v1839_v63 = vld [vmem:[#allocation5 + $0x48] sm:$0xff]  ;;  %v1840_v62 = vld [vmem:[#allocation5 + $0x50] sm:$0xff] }
 0x329   : > { %1194 = vmatpush.msrb.mxu0 %v2777_v18 }
 0x32a   : > { %1277 = vmatpush.msrb.mxu1 %v2687_v25  ;;  %1297 = vmatpush.msrb.mxu2 %v2690_v54  ;;  %v2808_v25 = vld [vmem:[#allocation5 + $0x40] sm:$0xff]  ;;  %v1842_v54 = vld [vmem:[#allocation5 + $0x30] sm:$0xff] }
 0x32b   : > { %1195 = vmatpush.msrb.mxu0 %v2782_v19 }
 0x32c   : > { %1278 = vmatpush.msrb.mxu1 %v2694_v29  ;;  %1298 = vmatpush.msrb.mxu2 %v2697_v61  ;;  %v1843_v29 = vld [vmem:[#allocation5 + $0x38] sm:$0xff]  ;;  %v2811_v61 = vld [vmem:[#allocation5 + $0x28] sm:$0xff] }
 0x32d   : > { %1196 = vmatpush.msrb.mxu0 %v2787_v21 }
 0x32e   : > { %1279 = vmatpush.msrb.mxu1 %v2701_v33  ;;  %1299 = vmatpush.msrb.mxu2 %v2704_v57  ;;  %v1845_v33 = vld [vmem:[#allocation5 + $0x18] sm:$0xff]  ;;  %v1846_v57 = vld [vmem:[#allocation5 + $0x20] sm:$0xff] }
 0x32f   : > { %1197 = vmatpush.msrb.mxu0 %v2792_v23 }
 0x330   : > { %1280 = vmatpush.msrb.mxu1 %v2708_v37  ;;  %1300 = vmatpush.msrb.mxu2 %v2711_v28  ;;  %v2814_v37 = vld [vmem:[#allocation5 + $0x10] sm:$0xff]  ;;  %v1848_v28 = vld [vmem:[#allocation5] sm:$0xff] }
 0x331   : > { %1198 = vmatpush.msrb.mxu0 %v2797_v26 }
 0x332   : > { %1281 = vmatpush.msrb.mxu1 %v2715_v40  ;;  %1301 = vmatpush.msrb.mxu2 %v2718_v50  ;;  %v1849_v40 = vld [vmem:[#allocation5 + $0x8] sm:$0xff]  ;;  %v1597_v50 = vld [vmem:[%s2176_s28 + $0x60] sm:$0xff] }
 0x333   : > { %1199 = vmatpush.msrb.mxu0 %v2802_v30 }
 0x334   : > { %1282 = vmatpush.msrb.mxu1 %v1836_v31  ;;  %1302 = vmatpush.msrb.mxu2 %v1837_v39 }
 0x335   : > { %1200 = vmatpush.msrb.mxu0 %v2805_v49 }
 0x336   : > { %1283 = vmatpush.msrb.mxu1 %v1839_v63  ;;  %1303 = vmatpush.msrb.mxu2 %v1840_v62  ;;  %v1015_v63 = vpop.permute.xlu2 %1014 }
 0x337   : > { %1201 = vmatpush.msrb.mxu0 %v2808_v25  ;;  %vm1016_vm4 = vcmp.eq.s32.totalorder %v1015_v63, 1 }
 0x338   : > { %1284 = vmatpush.msrb.mxu1 %v1842_v54  ;;  %1304 = vmatpush.msrb.mxu2 %v1843_v29 }
 0x339   : > { %1202 = vmatpush.msrb.mxu0 %v2811_v61 }
 0x33a   : > { %1285 = vmatpush.msrb.mxu1 %v1845_v33  ;;  %1305 = vmatpush.msrb.mxu2 %v1846_v57 }
 0x33b   : > { %1203 = vmatpush.msrb.mxu0 %v2814_v37 }
 0x33c   : > { %1286 = vmatpush.msrb.mxu1 %v1848_v28  ;;  %1306 = vmatpush.msrb.mxu2 %v1849_v40 }
 0x399   : > { %v919_v8 = vpop.f32.mrf.mxu0  ;;  %v939_v9 = vpop.f32.mrf.mxu1 }
 0x39a   : > { %v962_v10 = vadd.f32 %v1597_v50, %v919_v8  ;;  %v982_v24 = vadd.f32 %v1598_v5, %v939_v9 }
 0x39c   : > { %v1600_v44 = vmul.f32 -1.442695, %v962_v10  ;;  %v1601_v0 = vmul.f32 -1.442695, %v982_v24  ;;  %v2850_v10 = vld [vmem:[%s2936_s4] ss:$0 sm:$0xff] }
 0x39e   : > { %1761 = vpow2.f32 %v1600_v44 }
 0x39f   : > { %1763 = vpow2.f32 %v1601_v0 }
 0x3a0   : > { %v959_v12 = vpop.f32.mrf.mxu2 }
 0x3a1   : > { %v1002_v38 = vadd.f32 %v2495_v58, %v959_v12  ;;  %v1138_v12 = vpop.permute.xlu2 %1137 }
 0x3a4   : > { %v1762_v60 = vpop.eup %1761 }
 0x3a5   : > { %v1764_v48 = vpop.eup %1763  ;;  %v966_v56 = vadd.f32 1.0, %v1762_v60  ;;  %v1605_v60 = vld [vmem:[%s2176_s28 + $0x88] sm:$0xff] }
 0x3a6   : > { %v986_v32 = vadd.f32 1.0, %v1764_v48 }
 0x3a7   : > { %1765 = vrcp.f32 %v966_v56  ;;  %v978_v46 = vand.u32 2147483648, %v966_v56  ;;  %v976_v11 = vand.u32 2147483647, %v966_v56  ;;  %vm972_vm13 = vweird.f32 %v966_v56 }
 0x3a8   : > { %1767 = vrcp.f32 %v986_v32  ;;  %v998_v2 = vand.u32 2147483648, %v986_v32  ;;  %vm992_vm1 = vweird.f32 %v986_v32  ;;  %v996_v3 = vand.u32 2147483647, %v986_v32 }
 0x3a9   : > { %v979_v35 = vor.u32 1.1754944e-38, %v978_v46  ;;  %vm977_vm15 = vcmp.eq.f32.partialorder %v976_v11, 8.507059e+37 }
 0x3aa   : > { %v999_v31 = vor.u32 1.1754944e-38, %v998_v2  ;;  %vm997_vm3 = vcmp.eq.f32.partialorder %v996_v3, 8.507059e+37 }
 0x3ad   : > { %v1766_v45 = vpop.eup %1765 }
 0x3ae   : > { %v1768_v59 = vpop.eup %1767  ;;  %v968_v42 = vmul.f32 %v1766_v45, %v966_v56  ;;  %vm973_vm12 = vweird.f32 %v1766_v45 }
 0x3af   : > { %v988_v20 = vmul.f32 %v1768_v59, %v986_v32  ;;  %vm974_vm14 = vmor %vm972_vm13, %vm973_vm12  ;;  %vm993_vm0 = vweird.f32 %v1768_v59  ;;  %vm1139_vm13 = vcmp.eq.s32.totalorder %v1138_v12, 1 }
 0x3b0   : > { %v969_v51 = vsub.f32 1.0, %v968_v42  ;;  %vm994_vm2 = vmor %vm992_vm1, %vm993_vm0 }
 0x3b1   : > { %v989_v14 = vsub.f32 1.0, %v988_v20 }
 0x3b2   : > { %v970_v55 = vmul.f32 %v1766_v45, %v969_v51 }
 0x3b3   : > { %v990_v52 = vmul.f32 %v1768_v59, %v989_v14 }
 0x3b4   : > { %v971_v13 = vadd.f32 %v1766_v45, %v970_v55 }
 0x3b5   : > { %v991_v1 = vadd.f32 %v1768_v59, %v990_v52 }
 0x3b6   : > { %v975_v36 = vsel %vm974_vm14, %v1766_v45, %v971_v13 }
 0x3b7   : > { %v980_v43 = vsel %vm977_vm15, %v979_v35, %v975_v36  ;;  %v995_v4 = vsel %vm994_vm2, %v1768_v59, %v991_v1 }
 0x3b8   : > { %v1003_v47 = vmul.f32 %v1002_v38, %v980_v43  ;;  %v1000_v58 = vsel %vm997_vm3, %v999_v31, %v995_v4  ;;  %v1609_v38 = vld [vmem:[%s2176_s28 + $0x90] sm:$0xff] }
 0x3ba   : > { %v1004_v53 = vadd.f32 %v1599_v34, %v1003_v47  ;;  %v1610_v34 = vld [vmem:[%s2176_s28 + $0x98] sm:$0xff] }
 0x3bc   : > { %1769 = vtanh.f32 %v1004_v53 }
 0x3c2   : > { %v1770_v6 = vpop.eup %1769 }
 0x3c3   : > { %v1006_v39 = vsub.f32 %v2749_v7, %v1770_v6 }
 0x3c5   : > { %v1007_v62 = vmul.f32 %v1006_v39, %v1000_v58 }
 0x3c7   : > { %v1008_v54 = vadd.f32 %v1770_v6, %v1007_v62 }
 0x3c9   : > { %v1017_v29 = vsel %vm1016_vm4, %v1008_v54, 0.0  ;;  %v2823_v33 = vsel %vm1016_vm4, %v1008_v54, %v2749_v7  ;;  %v1603_v7 = vld [vmem:[%s2176_s28 + $0x78] sm:$0xff] }
 0x3ca   : > { %1602 = vst [vmem:[%s2187_s21 + $0x20] sm:$0xff] %v1017_v29  ;;  %1041 = vmatmul.f32.vlgmr.msrb.gmra.mxu3 %v2823_v33  ;;  %1061 = vmatmul.f32.vlgmr.msra.gmra.mxu0 %v2823_v33 }
 0x3cb   : > { %1081 = vmatmul.f32.vlgmr.msra.gmra.mxu1 %v2823_v33  ;;  %1311 = vmatpush.msrb.mxu3 %v2636_v16  ;;  %v1604_v16 = vld [vmem:[%s2176_s28 + $0x80] sm:$0xff] }
 0x3cd   : > { %1312 = vmatpush.msrb.mxu3 %v2645_v41 }
 0x3cf   : > { %1313 = vmatpush.msrb.mxu3 %v2654_v22 }
 0x3d1   : > { %1314 = vmatpush.msrb.mxu3 %v2663_v27 }
 0x3d3   : > { %1315 = vmatpush.msrb.mxu3 %v2767_v15 }
 0x3d5   : > { %1316 = vmatpush.msrb.mxu3 %v2772_v17 }
 0x3d7   : > { %1317 = vmatpush.msrb.mxu3 %v2777_v18 }
 0x3d9   : > { %1318 = vmatpush.msrb.mxu3 %v2782_v19 }
 0x3db   : > { %1319 = vmatpush.msrb.mxu3 %v2787_v21 }
 0x3dd   : > { %1320 = vmatpush.msrb.mxu3 %v2792_v23 }
 0x3df   : > { %1321 = vmatpush.msrb.mxu3 %v2797_v26 }
 0x3e1   : > { %1322 = vmatpush.msrb.mxu3 %v2802_v30 }
 0x3e3   : > { %1323 = vmatpush.msrb.mxu3 %v2805_v49 }
 0x3e5   : > { %1324 = vmatpush.msrb.mxu3 %v2808_v25 }
 0x3e7   : > { %1325 = vmatpush.msrb.mxu3 %v2811_v61 }
 0x3e9   : > { %1326 = vmatpush.msrb.mxu3 %v2814_v37 }
 0x447   : > { %v1062_v41 = vpop.f32.mrf.mxu0 }
 0x448   : > { %v1105_v22 = vadd.f32 %v1604_v16, %v1062_v41  ;;  %v1082_v50 = vpop.f32.mrf.mxu1 }
 0x449   : > { %v1125_v24 = vadd.f32 %v2850_v10, %v1082_v50  ;;  %v1261_v50 = vpop.permute.xlu0 %1260 }
 0x44a   : > { %v1607_v27 = vmul.f32 -1.442695, %v1105_v22 }
 0x44c   : > { %1771 = vpow2.f32 %v1607_v27 }
 0x44d   : > { %v1042_v15 = vpop.f32.mrf.mxu3 }
 0x44e   : > { %v1085_v17 = vadd.f32 %v1603_v7, %v1042_v15 }
 0x450   : > { %v1606_v18 = vmul.f32 -1.442695, %v1085_v17 }
 0x452   : > { %1773 = vpow2.f32 %v1606_v18  ;;  %v1772_v19 = vpop.eup %1771 }
 0x453   : > { %v1109_v23 = vadd.f32 1.0, %v1772_v19  ;;  %v1611_v19 = vld [vmem:[%s2176_s28 + $0xa0] sm:$0xff] }
 0x455   : > { %v1121_v59 = vand.u32 2147483648, %v1109_v23  ;;  %vm1115_vm10 = vweird.f32 %v1109_v23  ;;  %v1119_v42 = vand.u32 2147483647, %v1109_v23 }
 0x457   : > { %v1122_v46 = vor.u32 1.1754944e-38, %v1121_v59  ;;  %vm1120_vm12 = vcmp.eq.f32.partialorder %v1119_v42, 8.507059e+37 }
 0x458   : > { %v1774_v21 = vpop.eup %1773 }
 0x459   : > { %v1089_v26 = vadd.f32 1.0, %v1774_v21 }
 0x45b   : > { %1775 = vrcp.f32 %v1089_v26  ;;  %v1101_v37 = vand.u32 2147483648, %v1089_v26  ;;  %v1099_v40 = vand.u32 2147483647, %v1089_v26  ;;  %vm1095_vm6 = vweird.f32 %v1089_v26 }
 0x45c   : > { %1777 = vrcp.f32 %v1109_v23 }
 0x45d   : > { %v1102_v9 = vor.u32 1.1754944e-38, %v1101_v37  ;;  %vm1100_vm8 = vcmp.eq.f32.partialorder %v1099_v40, 8.507059e+37 }
 0x461   : > { %v1776_v30 = vpop.eup %1775 }
 0x462   : > { %v1778_v49 = vpop.eup %1777  ;;  %v1091_v25 = vmul.f32 %v1776_v30, %v1089_v26  ;;  %vm1096_vm5 = vweird.f32 %v1776_v30 }
 0x463   : > { %v1111_v57 = vmul.f32 %v1778_v49, %v1109_v23  ;;  %vm1097_vm7 = vmor %vm1095_vm6, %vm1096_vm5  ;;  %vm1116_vm9 = vweird.f32 %v1778_v49  ;;  %vm1262_vm6 = vcmp.eq.s32.totalorder %v1261_v50, 1 }
 0x464   : > { %v1092_v61 = vsub.f32 1.0, %v1091_v25  ;;  %vm1117_vm11 = vmor %vm1115_vm10, %vm1116_vm9 }
 0x465   : > { %v1112_v8 = vsub.f32 1.0, %v1111_v57 }
 0x466   : > { %v1093_v28 = vmul.f32 %v1776_v30, %v1092_v61 }
 0x467   : > { %v1113_v56 = vmul.f32 %v1778_v49, %v1112_v8 }
 0x468   : > { %v1094_v5 = vadd.f32 %v1776_v30, %v1093_v28 }
 0x469   : > { %v1114_v45 = vadd.f32 %v1778_v49, %v1113_v56  ;;  %v1616_v56 = vld [vmem:[%s2176_s28 + $0xb0] sm:$0xff] }
 0x46a   : > { %v1098_v44 = vsel %vm1097_vm7, %v1776_v30, %v1094_v5 }
 0x46b   : > { %v1103_v0 = vsel %vm1100_vm8, %v1102_v9, %v1098_v44  ;;  %v1118_v51 = vsel %vm1117_vm11, %v1778_v49, %v1114_v45  ;;  %v1615_v44 = vld [vmem:[%s2176_s28 + $0xa8] sm:$0xff] }
 0x46c   : > { %v1126_v48 = vmul.f32 %v1125_v24, %v1103_v0  ;;  %v1123_v11 = vsel %vm1120_vm12, %v1122_v46, %v1118_v51 }
 0x46e   : > { %v1127_v32 = vadd.f32 %v1605_v60, %v1126_v48 }
 0x470   : > { %1779 = vtanh.f32 %v1127_v32 }
 0x476   : > { %v1780_v20 = vpop.eup %1779 }
 0x477   : > { %v1129_v55 = vsub.f32 %v2823_v33, %v1780_v20 }
 0x479   : > { %v1130_v13 = vmul.f32 %v1129_v55, %v1123_v11 }
 0x47b   : > { %v1131_v14 = vadd.f32 %v1780_v20, %v1130_v13 }
 0x47d   : > { %v1140_v35 = vsel %vm1139_vm13, %v1131_v14, 0.0  ;;  %v2856_v36 = vsel %vm1139_vm13, %v1131_v14, %v2823_v33 }
 0x47e   : > { %1608 = vst [vmem:[%s2187_s21 + $0x28] sm:$0xff] %v1140_v35  ;;  %1164 = vmatmul.f32.vlgmr.msra.gmra.mxu2 %v2856_v36  ;;  %1184 = vmatmul.f32.vlgmr.msra.gmra.mxu3 %v2856_v36 }
 0x47f   : > { %1204 = vmatmul.f32.vlgmr.msrb.gmra.mxu0 %v2856_v36 }
 0x4fc   : > { %v1205_v41 = vpop.f32.mrf.mxu0 }
 0x4fd   : > { %v1248_v15 = vadd.f32 %v2850_v10, %v1205_v41 }
 0x501   : > { %v1165_v43 = vpop.f32.mrf.mxu2  ;;  %v1185_v47 = vpop.f32.mrf.mxu3 }
 0x502   : > { %v1208_v52 = vadd.f32 %v1609_v38, %v1165_v43  ;;  %v1228_v53 = vadd.f32 %v1610_v34, %v1185_v47 }
 0x504   : > { %v1612_v1 = vmul.f32 -1.442695, %v1208_v52  ;;  %v1613_v2 = vmul.f32 -1.442695, %v1228_v53 }
 0x506   : > { %1781 = vpow2.f32 %v1612_v1 }
 0x507   : > { %1783 = vpow2.f32 %v1613_v2  ;;  %v1617_v2 = vld [vmem:[%s2176_s28 + $0xb8] sm:$0xff]  ;;  %s1405_s28 = sshll.u32 %s2187_s21, 4  ;;  %s1406_s28 = int_to_ptr.vmem [resolvable:$true] %s1405_s28 }
 0x50c   : > { %v1782_v3 = vpop.eup %1781 }
 0x50d   : > { %v1784_v4 = vpop.eup %1783  ;;  %v1212_v6 = vadd.f32 1.0, %v1782_v3 }
 0x50e   : > { %v1232_v31 = vadd.f32 1.0, %v1784_v4 }
 0x50f   : > { %1785 = vrcp.f32 %v1212_v6  ;;  %v1224_v54 = vand.u32 2147483648, %v1212_v6  ;;  %v1222_v16 = vand.u32 2147483647, %v1212_v6  ;;  %vm1218_vm15 = vweird.f32 %v1212_v6 }
 0x510   : > { %1787 = vrcp.f32 %v1232_v31  ;;  %v1244_v49 = vand.u32 2147483648, %v1232_v31  ;;  %vm1238_vm3 = vweird.f32 %v1232_v31  ;;  %v1242_v25 = vand.u32 2147483647, %v1232_v31 }
 0x511   : > { %v1225_v27 = vor.u32 1.1754944e-38, %v1224_v54  ;;  %vm1223_vm1 = vcmp.eq.f32.partialorder %v1222_v16, 8.507059e+37  ;;  %v1384_v16 = vpop.permute.xlu1 %1383 }
 0x512   : > { %v1245_v37 = vor.u32 1.1754944e-38, %v1244_v49  ;;  %vm1243_vm5 = vcmp.eq.f32.partialorder %v1242_v25, 8.507059e+37 }
 0x515   : > { %v1786_v39 = vpop.eup %1785 }
 0x516   : > { %v1788_v58 = vpop.eup %1787  ;;  %v1214_v63 = vmul.f32 %v1786_v39, %v1212_v6  ;;  %vm1219_vm14 = vweird.f32 %v1786_v39 }
 0x517   : > { %v1234_v29 = vmul.f32 %v1788_v58, %v1232_v31  ;;  %vm1220_vm0 = vmor %vm1218_vm15, %vm1219_vm14  ;;  %vm1239_vm2 = vweird.f32 %v1788_v58  ;;  %vm1385_vm15 = vcmp.eq.s32.totalorder %v1384_v16, 1 }
 0x518   : > { %v1215_v62 = vsub.f32 1.0, %v1214_v63  ;;  %vm1240_vm4 = vmor %vm1238_vm3, %vm1239_vm2 }
 0x519   : > { %v1235_v7 = vsub.f32 1.0, %v1234_v29 }
 0x51a   : > { %v1216_v33 = vmul.f32 %v1786_v39, %v1215_v62 }
 0x51b   : > { %v1236_v23 = vmul.f32 %v1788_v58, %v1235_v7 }
 0x51c   : > { %v1217_v22 = vadd.f32 %v1786_v39, %v1216_v33 }
 0x51d   : > { %v1237_v30 = vadd.f32 %v1788_v58, %v1236_v23 }
 0x51e   : > { %v1221_v17 = vsel %vm1220_vm0, %v1786_v39, %v1217_v22 }
 0x51f   : > { %v1226_v18 = vsel %vm1223_vm1, %v1225_v27, %v1221_v17  ;;  %v1241_v61 = vsel %vm1240_vm4, %v1788_v58, %v1237_v30 }
 0x520   : > { %v1249_v21 = vmul.f32 %v1248_v15, %v1226_v18  ;;  %v1246_v40 = vsel %vm1243_vm5, %v1245_v37, %v1241_v61 }
 0x522   : > { %v1250_v26 = vadd.f32 %v1611_v19, %v1249_v21 }
 0x524   : > { %1789 = vtanh.f32 %v1250_v26 }
 0x52a   : > { %v1790_v57 = vpop.eup %1789 }
 0x52b   : > { %v1252_v28 = vsub.f32 %v2856_v36, %v1790_v57 }
 0x52d   : > { %v1253_v5 = vmul.f32 %v1252_v28, %v1246_v40 }
 0x52f   : > { %v1254_v8 = vadd.f32 %v1790_v57, %v1253_v5 }
 0x531   : > { %v1263_v9 = vsel %vm1262_vm6, %v1254_v8, 0.0  ;;  %v2868_v24 = vsel %vm1262_vm6, %v1254_v8, %v2856_v36 }
 0x532   : > { %1614 = vst [vmem:[%s2187_s21 + $0x30] sm:$0xff] %v1263_v9  ;;  %1287 = vmatmul.f32.vlgmr.msrb.gmra.mxu1 %v2868_v24  ;;  %1307 = vmatmul.f32.vlgmr.msrb.gmra.mxu2 %v2868_v24 }
 0x533   : > { %1327 = vmatmul.f32.vlgmr.msrb.gmra.mxu3 %v2868_v24 }
 0x5af   : > { %v1288_v0 = vpop.f32.mrf.mxu1 }
 0x5b0   : > { %v1331_v60 = vadd.f32 %v1615_v44, %v1288_v0 }
 0x5b2   : > { %v1618_v48 = vmul.f32 -1.442695, %v1331_v60 }
 0x5b4   : > { %1791 = vpow2.f32 %v1618_v48 }
 0x5b5   : > { %v1308_v32 = vpop.f32.mrf.mxu2 }
 0x5b6   : > { %v1351_v45 = vadd.f32 %v1616_v56, %v1308_v32  ;;  %v1328_v38 = vpop.f32.mrf.mxu3 }
 0x5b7   : > { %v1371_v1 = vadd.f32 %v2850_v10, %v1328_v38 }
 0x5b8   : > { %v1619_v59 = vmul.f32 -1.442695, %v1351_v45 }
 0x5ba   : > { %v1792_v42 = vpop.eup %1791  ;;  %1793 = vpow2.f32 %v1619_v59 }
 0x5bb   : > { %v1335_v51 = vadd.f32 1.0, %v1792_v42 }
 0x5bd   : > { %1795 = vrcp.f32 %v1335_v51  ;;  %v1347_v13 = vand.u32 2147483648, %v1335_v51  ;;  %v1345_v35 = vand.u32 2147483647, %v1335_v51  ;;  %vm1341_vm8 = vweird.f32 %v1335_v51 }
 0x5bf   : > { %v1348_v47 = vor.u32 1.1754944e-38, %v1347_v13  ;;  %vm1346_vm10 = vcmp.eq.f32.partialorder %v1345_v35, 8.507059e+37 }
 0x5c0   : > { %v1794_v20 = vpop.eup %1793 }
 0x5c1   : > { %v1355_v46 = vadd.f32 1.0, %v1794_v20 }
 0x5c3   : > { %v1796_v55 = vpop.eup %1795  ;;  %1797 = vrcp.f32 %v1355_v46  ;;  %v1367_v58 = vand.u32 2147483648, %v1355_v46  ;;  %vm1361_vm12 = vweird.f32 %v1355_v46  ;;  %v1365_v63 = vand.u32 2147483647, %v1355_v46 }
 0x5c4   : > { %v1337_v11 = vmul.f32 %v1796_v55, %v1335_v51  ;;  %vm1342_vm7 = vweird.f32 %v1796_v55 }
 0x5c5   : > { %vm1343_vm9 = vmor %vm1341_vm8, %vm1342_vm7  ;;  %v1368_v54 = vor.u32 1.1754944e-38, %v1367_v58  ;;  %vm1366_vm14 = vcmp.eq.f32.partialorder %v1365_v63, 8.507059e+37 }
 0x5c6   : > { %v1338_v12 = vsub.f32 1.0, %v1337_v11 }
 0x5c8   : > { %v1339_v14 = vmul.f32 %v1796_v55, %v1338_v12 }
 0x5c9   : > { %v1798_v36 = vpop.eup %1797 }
 0x5ca   : > { %v1357_v34 = vmul.f32 %v1798_v36, %v1355_v46  ;;  %v1340_v43 = vadd.f32 %v1796_v55, %v1339_v14  ;;  %vm1362_vm11 = vweird.f32 %v1798_v36 }
 0x5cb   : > { %vm1363_vm13 = vmor %vm1361_vm12, %vm1362_vm11 }
 0x5cc   : > { %v1358_v52 = vsub.f32 1.0, %v1357_v34  ;;  %v1344_v53 = vsel %vm1343_vm9, %v1796_v55, %v1340_v43 }
 0x5cd   : > { %v1349_v3 = vsel %vm1346_vm10, %v1348_v47, %v1344_v53 }
 0x5ce   : > { %v1372_v4 = vmul.f32 %v1371_v1, %v1349_v3  ;;  %v1359_v6 = vmul.f32 %v1798_v36, %v1358_v52 }
 0x5d0   : > { %v1373_v31 = vadd.f32 %v1617_v2, %v1372_v4  ;;  %v1360_v39 = vadd.f32 %v1798_v36, %v1359_v6 }
 0x5d2   : > { %1799 = vtanh.f32 %v1373_v31  ;;  %v1364_v62 = vsel %vm1363_vm13, %v1798_v36, %v1360_v39 }
 0x5d3   : > { %v1369_v33 = vsel %vm1366_vm14, %v1368_v54, %v1364_v62 }
 0x5d8   : > { %v1800_v10 = vpop.eup %1799 }
 0x5d9   : > { %v1375_v29 = vsub.f32 %v2868_v24, %v1800_v10 }
 0x5db   : > { %v1376_v41 = vmul.f32 %v1375_v29, %v1369_v33 }
 0x5dd   : > { %v1377_v22 = vadd.f32 %v1800_v10, %v1376_v41 }
 0x5df   : > { %v1386_v27 = vsel %vm1385_vm15, %v1377_v22, 0.0  ;;  %v1389_v7 = vsel %vm1385_vm15, %v1377_v22, %v2868_v24 }
 0x5e0   : > { %1620 = vst [vmem:[%s2187_s21 + $0x38] sm:$0xff] %v1386_v27 }
 0x5e1   : > { %1938 = shalt.err (!%p1935_p7)
}
 0x5e2   : > { %s2036_s18 = smov 128   ;;  %s2037_s21 = smov 8   ;;  %1390 = vst [vmem:[#allocation8] sm:$0xff] %v1389_v7 }
 0x5e3   : > { %1638 = dma.vmem_to_hbm [thread:$0]  (%p2151_p5), %s1406_s28, 1024, %s1408_s11, %s1392_s3, %s2036_s18, %s2036_s18, %s2037_s21  }
 0x5e4   : > { %1640 = dma.vmem_to_hbm [thread:$0]  (%p2111_p2), %s1423_s13, 128, %s1425_s15, [#allocation9]  }
 0x5e5   : > { %2000 = dma.done.wait (%p2111_p2), [#allocation9], 128  }
 0x5e6   : > { %2002 = vsyncadd (%p2111_p2), [#allocation9], 4294967168 }
 0x5e7 PF: > { %s3011_s10 = sld [smem:[#allocation14_spill]]  ;;  %p1653_p9 = pnand %p1568_p11, %p2122_p6 }
 0x5e9   : > { %p1654_p10 = pneg %p1653_p9 }
 0x5ed   : > { %s1441_s14 = sand.u32 1, %s3011_s10  }
 0x5ee   : > { %s1442_s20 = scalar_lea.sflag [#allocation4], %s1441_s14 }
 0x5ef   : > { %2004 = dma.done.wait (%p1654_p10), %s1442_s20, 1024  }
 0x5f0   : > { %2006 = vsyncadd (%p1654_p10), %s1442_s20, 4294966272  ;;  %s25_s26 = sadd.s32 1, %s2029_s26   ;;  %s3013_s30 = sld [smem:[#allocation16_spill]] }
 0x5f1   : > { %p22_p5 = scmp.ge.s32.totalorder %s25_s26, 4   ;;  %s3014_s21 = smov %s2013_s22 }
 0x5f2   : > { %s3015_s22 = smov %s2017_s23  ;;  %s3016_s23 = smov %s2160_s9 }
 0x5f3   : > { %s3017_s24 = smov %s2025_s25  ;;  %24 = sbr.rel (!%p22_p5) target bundleno = 10 (0xa), region = 122 }
 0x5f6   : > { %s3018_s25 = smov %s3013_s30 }
 0x5f8   :  { %1448 = vsyncpa [#allocation3], 1 }
 0x5f9   :  { %1450 = vsyncpa [#allocation3 + $0x1], 1 }
 0x5fa   :  { %1451 = vsyncpa [#allocation6], 1 }
 0x5fb   :  { %1452 = vsyncpa [#allocation4], 1 }
 0x5fc   :  { %1454 = vsyncpa [#allocation4 + $0x1], 1 }
 0x5fd   :  { %1455 = vsyncpa [#allocation9], 1 }

</bundles_post_ra>
